<compile_context>
chip_gen: v7x
topology: tpu7x:2x2x1
jax: 0.10.0
libtpu: 0.0.40
codegen_flags: <defaults>
</compile_context>

<pallas_src>
import numpy as np

import jax
import jax.numpy as jnp
from jax.experimental import pallas as pl
from jax.experimental.pallas import tpu as pltpu  # noqa: F401  (kept for TPU-specific tuning hooks)


# ----------------------------------------------------------------------------
# Fully fused HumanNode forward kernel
# ----------------------------------------------------------------------------
def _make_fused_kernel(N, R, L):
    """Builds the fused forward kernel.

    N : number of human nodes (cell-GRU sequence length is N+1)
    R : human_node_rnn_size (GRU hidden size)
    L : num_layers
    """
    S = N + 1
    H3 = 3 * R

    def gru_step(gi, h, whh, bhh):
        # gi already contains x @ w_ih + b_ih (packed gates, torch order r,z,n)
        gh = jnp.dot(h, whh, preferred_element_type=jnp.float32) + bhh
        r = jax.nn.sigmoid(gi[:, 0:R] + gh[:, 0:R])
        z = jax.nn.sigmoid(gi[:, R:2 * R] + gh[:, R:2 * R])
        n = jnp.tanh(gi[:, 2 * R:H3] + r * gh[:, 2 * R:H3])
        return (1.0 - z) * n + z * h

    def input_gates(x, wih, bih):
        # Degenerate K == 1 contraction stays on the VPU (broadcast-mul).
        if wih.shape[0] == 1:
            return x * wih[0:1, :] + bih
        return jnp.dot(x, wih, preferred_element_type=jnp.float32) + bih

    def kernel(*refs):
        (pos_ref, dist_t_ref, vel_ref, h_prev_ref,
         win_t_ref, in_bias_ref, wedge_t_ref, ih_bias_ref,
         who_t_ref, out_bias_ref) = refs[:10]
        idx = 10
        cell_p = [refs[idx + 4 * l: idx + 4 * (l + 1)] for l in range(L)]
        idx += 4 * L
        vel_p = [refs[idx + 4 * l: idx + 4 * (l + 1)] for l in range(L)]
        idx += 4 * L
        final_ref, h_curr_ref = refs[idx], refs[idx + 1]

        B = pos_ref.shape[1]

        # ---- hoisted weight / bias loads (read once, live in VMEM) --------
        win_t = win_t_ref[...]                    # (2, E)
        in_bias = in_bias_ref[...]                # (1, E)
        who_t = who_t_ref[...]                    # (R, 2)
        out_bias2 = 2.0 * out_bias_ref[...]       # fused (vel + pos) bias
        cell_w = [tuple(p[...] for p in lp) for lp in cell_p]
        vel_w = [tuple(p[...] for p in lp) for lp in vel_p]

        # ---- input encoders (vectorized over all timesteps) ----------------
        # encoded_input = relu(position @ win.T + in_bias); K = 2 -> two VPU
        # broadcast-multiplies over the whole (N*B, E) slab, no MXU push.
        pos2 = pos_ref[...].reshape(N * B, 2)
        enc = jnp.maximum(pos2[:, 0:1] * win_t[0:1, :]
                          + pos2[:, 1:2] * win_t[1:2, :] + in_bias, 0.0)

        # embedded_edge = relu(distance.T @ w_edge_tmp.T + ih_bias) : (B, E)
        edge = jnp.dot(dist_t_ref[...], wedge_t_ref[...],
                       preferred_element_type=jnp.float32)
        edge = jnp.maximum(edge + ih_bias_ref[...], 0.0)

        # concat((encoded_input, embedded_edge), dim=0) flattened to (S*B, E)
        x_all = jnp.concatenate([enc, edge], axis=0)

        # Layer-0 input gates for the WHOLE cell sequence in one MXU push.
        wih0, whh0, bih0, bhh0 = cell_w[0]
        gi0_all = jnp.dot(x_all, wih0,
                          preferred_element_type=jnp.float32) + bih0  # (S*B, 3R)

        # ---- cell GRU: seq = N+1 nodes, batch = max_len (unrolled) ----------
        h = [h_prev_ref[l] for l in range(L)]                         # (B, R)
        cell_out = []
        for s in range(S):
            h[0] = gru_step(gi0_all[s * B:(s + 1) * B, :], h[0], whh0, bhh0)
            x = h[0]
            for l in range(1, L):
                wih, whh, bih, bhh = cell_w[l]
                gi = input_gates(x, wih, bih)
                h[l] = gru_step(gi, h[l], whh, bhh)
                x = h[l]
            cell_out.append(x)                                        # (B, R)

        # ---- vel_gru: single timestep, seeded with the cell GRU hidden -----
        x = vel_ref[...]                                              # (B, 1)
        for l in range(L):
            wih, whh, bih, bhh = vel_w[l]
            gi = input_gates(x, wih, bih)                 # K=1 -> VPU for l=0
            h[l] = gru_step(gi, h[l], whh, bhh)
            x = h[l]
        vel_hidden = x                                                # (B, R)

        # ---- fused epilogue: projection + final add (single MXU push) -------
        # final[s] = (cell_out[s] + vel_hidden) @ who.T + 2*out_bias
        comb = jnp.concatenate([co + vel_hidden for co in cell_out],
                               axis=0)                                # (S*B, R)
        proj = jnp.dot(comb, who_t,
                       preferred_element_type=jnp.float32) + out_bias2
        final_ref[...] = proj.reshape(S, B, 2).astype(final_ref.dtype)
        h_curr_ref[...] = jnp.stack(h, axis=0).astype(h_curr_ref.dtype)

    return kernel


# ----------------------------------------------------------------------------
# HumanNode.forward  (differ=False, updateAdj=False, retain path)
# ----------------------------------------------------------------------------
def human_node_forward(position, distance, velocity, h_prev, c_prev, params,
                       max_len):
    del c_prev  # unused by the torch forward as well
    c_curr = jnp.zeros((1, 256), jnp.float32)      # torch hard-codes (1, 256)

    N, T, _ = position.shape
    R = params["who"].shape[1]
    L = h_prev.shape[0]
    max_len = max(max_len, T)
    # As in the torch reference, the seq-axis concat of (N, max_len, E) with
    # the (1, T, E) edge embedding only type-checks when T == max_len.
    assert T == max_len, "position.shape[1] must equal max_len after update"

    def pad_axis(a, axis, target):                 # torch cats zeros -> zero pad
        pad = target - a.shape[axis]
        if pad <= 0:
            return a
        widths = [(0, 0)] * a.ndim
        widths[axis] = (0, pad)
        return jnp.pad(a, widths)

    h_prev = pad_axis(h_prev, 1, max_len)
    velocity = pad_axis(velocity, 0, max_len)

    f32 = lambda x: jnp.asarray(x, jnp.float32)
    inputs = [
        f32(position),                 # (N, B, 2)
        f32(distance).T,               # (B, D0)
        f32(velocity),                 # (B, 1)
        f32(h_prev),                   # (L, B, R)
        f32(params["win"]).T,          # (2, E)
        f32(params["in_bias"]),        # (1, E)
        f32(params["w_edge_tmp"]).T,   # (D0, E)
        f32(params["ih_bias"]),        # (1, E)
        f32(params["who"]).T,          # (R, 2)
        f32(params["out_bias"]),       # (1, 2)
    ]
    for layer in params["cell_layers"]:
        inputs.extend(f32(p) for p in layer)       # (I,3R),(R,3R),(1,3R),(1,3R)
    for layer in params["vel_gru_layers"]:
        inputs.extend(f32(p) for p in layer)

    final_output, h_curr = pl.pallas_call(
        _make_fused_kernel(N, R, L),
        out_shape=(
            jax.ShapeDtypeStruct((N + 1, max_len, 2), jnp.float32),
            jax.ShapeDtypeStruct((L, max_len, R), jnp.float32),
        ),
    )(*inputs)
    return final_output, h_curr, c_curr, max_len


# ----------------------------------------------------------------------------
# Parameter init (deterministic, synthetic -- shapes follow the torch module).
# GRU weights are generated directly in packed layout: w_ih (I, 3H),
# w_hh (H, 3H), b_ih (1, 3H), b_hh (1, 3H), gate order (r, z, n).
# ----------------------------------------------------------------------------
def init_gru_params(key, input_size, hidden_size, num_layers):
    layers = []
    scale = 1.0 / float(hidden_size) ** 0.5
    for l in range(num_layers):
        isz = input_size if l == 0 else hidden_size
        key, k1, k2, k3, k4 = jax.random.split(key, 5)
        w_ih = jax.random.uniform(k1, (isz, 3 * hidden_size),
                                  minval=-scale, maxval=scale, dtype=jnp.float32)
        w_hh = jax.random.uniform(k2, (hidden_size, 3 * hidden_size),
                                  minval=-scale, maxval=scale, dtype=jnp.float32)
        b_ih = jax.random.uniform(k3, (1, 3 * hidden_size),
                                  minval=-scale, maxval=scale, dtype=jnp.float32)
        b_hh = jax.random.uniform(k4, (1, 3 * hidden_size),
                                  minval=-scale, maxval=scale, dtype=jnp.float32)
        layers.append((w_ih, w_hh, b_ih, b_hh))
    return layers


# ----------------------------------------------------------------------------
# Pure-numpy reference (unfused, mirrors the torch forward) for a sanity check
# ----------------------------------------------------------------------------
def _np_reference_forward(position, distance, velocity, h_prev, params, max_len):
    def lin(x, w, b):
        return x @ w.T + b

    def sigmoid(x):
        return 1.0 / (1.0 + np.exp(-x))

    def gru(x_seq, h0, layers):
        Rh = h0.shape[-1]
        h = [h0[l] for l in range(len(layers))]
        outs = []
        for s in range(x_seq.shape[0]):
            x = x_seq[s]
            for l, (wih, whh, bih, bhh) in enumerate(layers):
                gi = x @ wih + bih
                gh = h[l] @ whh + bhh
                r = sigmoid(gi[:, :Rh] + gh[:, :Rh])
                z = sigmoid(gi[:, Rh:2 * Rh] + gh[:, Rh:2 * Rh])
                n = np.tanh(gi[:, 2 * Rh:] + r * gh[:, 2 * Rh:])
                h[l] = (1.0 - z) * n + z * h[l]
                x = h[l]
            outs.append(x)
        return np.stack(outs, 0), np.stack(h, 0)

    enc = np.maximum(lin(position, params["win"], params["in_bias"]), 0.0)
    edge = np.maximum(lin(distance.T, params["w_edge_tmp"], params["ih_bias"]),
                      0.0)[None]
    T = enc.shape[1]
    max_len = max(max_len, T)
    pad = max_len - velocity.shape[0]
    vel = (np.concatenate([velocity,
                           np.zeros((pad, velocity.shape[1]), velocity.dtype)], 0)
           if pad > 0 else velocity)
    concat = np.concatenate([enc, edge], axis=0)
    out, h_curr = gru(concat, h_prev, params["cell_layers"])
    pos_out = lin(out, params["who"], params["out_bias"])
    out, h_curr = gru(vel[None], h_curr, params["vel_gru_layers"])
    vel_out = lin(out, params["who"], params["out_bias"])
    return vel_out + pos_out, h_curr


if __name__ == "__main__":
    key = jax.random.PRNGKey(0)

    # "args"
    E = 16        # human_node_embedding_size
    R = 32        # human_node_rnn_size
    L = 2         # num_layers
    MAX_LEN = 8   # args.max_len

    # input shapes
    N = 3         # position.size(0): number of human nodes
    T = 8         # position.size(1): slot axis (== max_len here)
    D0 = 5        # distance.size(0)
    V = 6         # velocity length (< max_len, exercises zero-padding)

    ks = jax.random.split(key, 12)
    position = jax.random.normal(ks[0], (N, T, 2), jnp.float32)
    distance = jax.random.normal(ks[1], (D0, T), jnp.float32)
    velocity = jax.random.normal(ks[2], (V, 1), jnp.float32)
    h_prev = jax.random.normal(ks[3], (L, T, R), jnp.float32)
    c_prev = jnp.zeros((1, 256), jnp.float32)

    bound = 1.0 / E
    params = {
        # reset_parameters(): weights ~ N(0, 0.5), biases ~ U(-bound, bound)
        "win": 0.5 * jax.random.normal(ks[4], (E, 2), jnp.float32),
        "in_bias": jax.random.uniform(ks[5], (1, E), minval=-bound, maxval=bound,
                                      dtype=jnp.float32),
        "w_edge_tmp": 0.5 * jax.random.normal(ks[6], (E, D0), jnp.float32),
        "ih_bias": jax.random.uniform(ks[7], (1, E), minval=-bound, maxval=bound,
                                      dtype=jnp.float32),
        "who": 0.5 * jax.random.normal(ks[8], (2, R), jnp.float32),
        "out_bias": jax.random.uniform(ks[9], (1, 2), minval=-bound, maxval=bound,
                                       dtype=jnp.float32),
        # self.cell: GRU(input=E, hidden=R, layers=L); vel_gru: GRU(input=1, ...)
        "cell_layers": init_gru_params(ks[10], E, R, L),
        "vel_gru_layers": init_gru_params(ks[11], 1, R, L),
    }

    final_output, h_curr, c_curr, max_len = human_node_forward(
        position, distance, velocity, h_prev, c_prev, params, MAX_LEN)
    jax.block_until_ready((final_output, h_curr, c_curr))

    assert final_output.shape == (N + 1, max_len, 2), final_output.shape
    assert h_curr.shape == (L, max_len, R), h_curr.shape
    assert c_curr.shape == (1, 256), c_curr.shape

    # Numerical sanity check against a pure-numpy, unfused reference.
    np_params = jax.tree_util.tree_map(np.asarray, params)
    ref_out, ref_h = _np_reference_forward(
        np.asarray(position), np.asarray(distance), np.asarray(velocity),
        np.asarray(h_prev), np_params, MAX_LEN)
    np.testing.assert_allclose(np.asarray(final_output), ref_out,
                               rtol=5e-2, atol=5e-2)
    np.testing.assert_allclose(np.asarray(h_curr), ref_h, rtol=5e-2, atol=5e-2)

    print("KERNEL_OK")
</pallas_src>

<mosaic_0001>
module attributes {stable_mosaic.version = 11 : i64} {
  func.func @kernel(%arg0: memref<3x8x2xf32, #tpu.memory_space<vmem>>, %arg1: memref<8x5xf32, #tpu.memory_space<vmem>>, %arg2: memref<8x1xf32, #tpu.memory_space<vmem>>, %arg3: memref<2x8x32xf32, #tpu.memory_space<vmem>>, %arg4: memref<2x16xf32, #tpu.memory_space<vmem>>, %arg5: memref<1x16xf32, #tpu.memory_space<vmem>>, %arg6: memref<5x16xf32, #tpu.memory_space<vmem>>, %arg7: memref<1x16xf32, #tpu.memory_space<vmem>>, %arg8: memref<32x2xf32, #tpu.memory_space<vmem>>, %arg9: memref<1x2xf32, #tpu.memory_space<vmem>>, %arg10: memref<16x96xf32, #tpu.memory_space<vmem>>, %arg11: memref<32x96xf32, #tpu.memory_space<vmem>>, %arg12: memref<1x96xf32, #tpu.memory_space<vmem>>, %arg13: memref<1x96xf32, #tpu.memory_space<vmem>>, %arg14: memref<32x96xf32, #tpu.memory_space<vmem>>, %arg15: memref<32x96xf32, #tpu.memory_space<vmem>>, %arg16: memref<1x96xf32, #tpu.memory_space<vmem>>, %arg17: memref<1x96xf32, #tpu.memory_space<vmem>>, %arg18: memref<1x96xf32, #tpu.memory_space<vmem>>, %arg19: memref<32x96xf32, #tpu.memory_space<vmem>>, %arg20: memref<1x96xf32, #tpu.memory_space<vmem>>, %arg21: memref<1x96xf32, #tpu.memory_space<vmem>>, %arg22: memref<32x96xf32, #tpu.memory_space<vmem>>, %arg23: memref<32x96xf32, #tpu.memory_space<vmem>>, %arg24: memref<1x96xf32, #tpu.memory_space<vmem>>, %arg25: memref<1x96xf32, #tpu.memory_space<vmem>>, %arg26: memref<4x8x2xf32, #tpu.memory_space<vmem>>, %arg27: memref<2x8x32xf32, #tpu.memory_space<vmem>>) attributes {dimension_semantics = [], scalar_prefetch = 0 : i64, scratch_operands = 0 : i64, tpu.core_type = #tpu.core_type<tc>} {
    %c0 = arith.constant 0 : index
    %c0_0 = arith.constant 0 : index
    %0 = vector.load %arg4[%c0, %c0_0] : memref<2x16xf32, #tpu.memory_space<vmem>>, vector<2x16xf32>
    %c0_1 = arith.constant 0 : index
    %c0_2 = arith.constant 0 : index
    %1 = vector.load %arg5[%c0_1, %c0_2] : memref<1x16xf32, #tpu.memory_space<vmem>>, vector<1x16xf32>
    %c0_3 = arith.constant 0 : index
    %c0_4 = arith.constant 0 : index
    %2 = vector.load %arg8[%c0_3, %c0_4] : memref<32x2xf32, #tpu.memory_space<vmem>>, vector<32x2xf32>
    %c0_5 = arith.constant 0 : index
    %c0_6 = arith.constant 0 : index
    %3 = vector.load %arg9[%c0_5, %c0_6] : memref<1x2xf32, #tpu.memory_space<vmem>>, vector<1x2xf32>
    %cst = arith.constant 2.000000e+00 : f32
    %4 = vector.broadcast %cst : f32 to vector<1x2xf32>
    %5 = arith.mulf %4, %3 : vector<1x2xf32>
    %c0_7 = arith.constant 0 : index
    %c0_8 = arith.constant 0 : index
    %6 = vector.load %arg10[%c0_7, %c0_8] : memref<16x96xf32, #tpu.memory_space<vmem>>, vector<16x96xf32>
    %c0_9 = arith.constant 0 : index
    %c0_10 = arith.constant 0 : index
    %7 = vector.load %arg11[%c0_9, %c0_10] : memref<32x96xf32, #tpu.memory_space<vmem>>, vector<32x96xf32>
    %c0_11 = arith.constant 0 : index
    %c0_12 = arith.constant 0 : index
    %8 = vector.load %arg12[%c0_11, %c0_12] : memref<1x96xf32, #tpu.memory_space<vmem>>, vector<1x96xf32>
    %c0_13 = arith.constant 0 : index
    %c0_14 = arith.constant 0 : index
    %9 = vector.load %arg13[%c0_13, %c0_14] : memref<1x96xf32, #tpu.memory_space<vmem>>, vector<1x96xf32>
    %c0_15 = arith.constant 0 : index
    %c0_16 = arith.constant 0 : index
    %10 = vector.load %arg14[%c0_15, %c0_16] : memref<32x96xf32, #tpu.memory_space<vmem>>, vector<32x96xf32>
    %c0_17 = arith.constant 0 : index
    %c0_18 = arith.constant 0 : index
    %11 = vector.load %arg15[%c0_17, %c0_18] : memref<32x96xf32, #tpu.memory_space<vmem>>, vector<32x96xf32>
    %c0_19 = arith.constant 0 : index
    %c0_20 = arith.constant 0 : index
    %12 = vector.load %arg16[%c0_19, %c0_20] : memref<1x96xf32, #tpu.memory_space<vmem>>, vector<1x96xf32>
    %c0_21 = arith.constant 0 : index
    %c0_22 = arith.constant 0 : index
    %13 = vector.load %arg17[%c0_21, %c0_22] : memref<1x96xf32, #tpu.memory_space<vmem>>, vector<1x96xf32>
    %c0_23 = arith.constant 0 : index
    %c0_24 = arith.constant 0 : index
    %14 = vector.load %arg18[%c0_23, %c0_24] : memref<1x96xf32, #tpu.memory_space<vmem>>, vector<1x96xf32>
    %c0_25 = arith.constant 0 : index
    %c0_26 = arith.constant 0 : index
    %15 = vector.load %arg19[%c0_25, %c0_26] : memref<32x96xf32, #tpu.memory_space<vmem>>, vector<32x96xf32>
    %c0_27 = arith.constant 0 : index
    %c0_28 = arith.constant 0 : index
    %16 = vector.load %arg20[%c0_27, %c0_28] : memref<1x96xf32, #tpu.memory_space<vmem>>, vector<1x96xf32>
    %c0_29 = arith.constant 0 : index
    %c0_30 = arith.constant 0 : index
    %17 = vector.load %arg21[%c0_29, %c0_30] : memref<1x96xf32, #tpu.memory_space<vmem>>, vector<1x96xf32>
    %c0_31 = arith.constant 0 : index
    %c0_32 = arith.constant 0 : index
    %18 = vector.load %arg22[%c0_31, %c0_32] : memref<32x96xf32, #tpu.memory_space<vmem>>, vector<32x96xf32>
    %c0_33 = arith.constant 0 : index
    %c0_34 = arith.constant 0 : index
    %19 = vector.load %arg23[%c0_33, %c0_34] : memref<32x96xf32, #tpu.memory_space<vmem>>, vector<32x96xf32>
    %c0_35 = arith.constant 0 : index
    %c0_36 = arith.constant 0 : index
    %20 = vector.load %arg24[%c0_35, %c0_36] : memref<1x96xf32, #tpu.memory_space<vmem>>, vector<1x96xf32>
    %c0_37 = arith.constant 0 : index
    %c0_38 = arith.constant 0 : index
    %21 = vector.load %arg25[%c0_37, %c0_38] : memref<1x96xf32, #tpu.memory_space<vmem>>, vector<1x96xf32>
    %c0_39 = arith.constant 0 : index
    %c0_40 = arith.constant 0 : index
    %c0_41 = arith.constant 0 : index
    %22 = vector.load %arg0[%c0_39, %c0_40, %c0_41] : memref<3x8x2xf32, #tpu.memory_space<vmem>>, vector<3x8x2xf32>
    %23 = vector.shape_cast %22 : vector<3x8x2xf32> to vector<24x2xf32>
    %24 = vector.extract_strided_slice %23 {offsets = [0, 0], sizes = [24, 1], strides = [1, 1]} : vector<24x2xf32> to vector<24x1xf32>
    %25 = vector.extract_strided_slice %0 {offsets = [0, 0], sizes = [1, 16], strides = [1, 1]} : vector<2x16xf32> to vector<1x16xf32>
    %26 = vector.broadcast %24 : vector<24x1xf32> to vector<24x16xf32>
    %27 = vector.broadcast %25 : vector<1x16xf32> to vector<24x16xf32>
    %28 = arith.mulf %26, %27 : vector<24x16xf32>
    %29 = vector.extract_strided_slice %23 {offsets = [0, 1], sizes = [24, 1], strides = [1, 1]} : vector<24x2xf32> to vector<24x1xf32>
    %30 = vector.extract_strided_slice %0 {offsets = [1, 0], sizes = [1, 16], strides = [1, 1]} : vector<2x16xf32> to vector<1x16xf32>
    %31 = vector.broadcast %29 : vector<24x1xf32> to vector<24x16xf32>
    %32 = vector.broadcast %30 : vector<1x16xf32> to vector<24x16xf32>
    %33 = arith.mulf %31, %32 : vector<24x16xf32>
    %34 = arith.addf %28, %33 : vector<24x16xf32>
    %35 = vector.broadcast %1 : vector<1x16xf32> to vector<24x16xf32>
    %36 = arith.addf %34, %35 : vector<24x16xf32>
    %cst_42 = arith.constant 0.000000e+00 : f32
    %37 = vector.broadcast %cst_42 : f32 to vector<24x16xf32>
    %38 = arith.maximumf %36, %37 : vector<24x16xf32>
    %c0_43 = arith.constant 0 : index
    %c0_44 = arith.constant 0 : index
    %39 = vector.load %arg1[%c0_43, %c0_44] : memref<8x5xf32, #tpu.memory_space<vmem>>, vector<8x5xf32>
    %c0_45 = arith.constant 0 : index
    %c0_46 = arith.constant 0 : index
    %40 = vector.load %arg6[%c0_45, %c0_46] : memref<5x16xf32, #tpu.memory_space<vmem>>, vector<5x16xf32>
    %cst_47 = arith.constant dense<0.000000e+00> : vector<8x16xf32>
    %41 = tpu.matmul %39, %40, %cst_47 {dimension_numbers = #tpu.dot_dimension_numbers<[1], [0], [0], [1], [0, 0, 1, 1], [], []>} : vector<8x5xf32>, vector<5x16xf32>, vector<8x16xf32> -> vector<8x16xf32>
    %c0_48 = arith.constant 0 : index
    %c0_49 = arith.constant 0 : index
    %42 = vector.load %arg7[%c0_48, %c0_49] : memref<1x16xf32, #tpu.memory_space<vmem>>, vector<1x16xf32>
    %43 = vector.broadcast %42 : vector<1x16xf32> to vector<8x16xf32>
    %44 = arith.addf %41, %43 : vector<8x16xf32>
    %cst_50 = arith.constant 0.000000e+00 : f32
    %45 = vector.broadcast %cst_50 : f32 to vector<8x16xf32>
    %46 = arith.maximumf %44, %45 : vector<8x16xf32>
    %47 = tpu.concatenate %38, %46 in 0 : vector<24x16xf32>, vector<8x16xf32> -> vector<32x16xf32>
    %cst_51 = arith.constant dense<0.000000e+00> : vector<32x96xf32>
    %48 = tpu.matmul %47, %6, %cst_51 {dimension_numbers = #tpu.dot_dimension_numbers<[1], [0], [0], [1], [0, 0, 1, 1], [], []>} : vector<32x16xf32>, vector<16x96xf32>, vector<32x96xf32> -> vector<32x96xf32>
    %49 = vector.broadcast %8 : vector<1x96xf32> to vector<32x96xf32>
    %50 = arith.addf %48, %49 : vector<32x96xf32>
    %c0_52 = arith.constant 0 : index
    %c0_53 = arith.constant 0 : index
    %c0_54 = arith.constant 0 : index
    %51 = vector.load %arg3[%c0_52, %c0_53, %c0_54] : memref<2x8x32xf32, #tpu.memory_space<vmem>>, vector<1x8x32xf32>
    %52 = vector.shape_cast %51 : vector<1x8x32xf32> to vector<8x32xf32>
    %c1 = arith.constant 1 : index
    %c0_55 = arith.constant 0 : index
    %c0_56 = arith.constant 0 : index
    %53 = vector.load %arg3[%c1, %c0_55, %c0_56] : memref<2x8x32xf32, #tpu.memory_space<vmem>>, vector<1x8x32xf32>
    %54 = vector.shape_cast %53 : vector<1x8x32xf32> to vector<8x32xf32>
    %55 = vector.extract_strided_slice %50 {offsets = [0, 0], sizes = [8, 96], strides = [1, 1]} : vector<32x96xf32> to vector<8x96xf32>
    %cst_57 = arith.constant dense<0.000000e+00> : vector<8x96xf32>
    %56 = tpu.matmul %52, %7, %cst_57 {dimension_numbers = #tpu.dot_dimension_numbers<[1], [0], [0], [1], [0, 0, 1, 1], [], []>} : vector<8x32xf32>, vector<32x96xf32>, vector<8x96xf32> -> vector<8x96xf32>
    %57 = vector.broadcast %9 : vector<1x96xf32> to vector<8x96xf32>
    %58 = arith.addf %56, %57 : vector<8x96xf32>
    %59 = vector.extract_strided_slice %55 {offsets = [0, 0], sizes = [8, 32], strides = [1, 1]} : vector<8x96xf32> to vector<8x32xf32>
    %60 = vector.extract_strided_slice %58 {offsets = [0, 0], sizes = [8, 32], strides = [1, 1]} : vector<8x96xf32> to vector<8x32xf32>
    %61 = arith.addf %59, %60 : vector<8x32xf32>
    %62 = arith.negf %61 : vector<8x32xf32>
    %63 = math.exp %62 : vector<8x32xf32>
    %cst_58 = arith.constant 1.000000e+00 : f32
    %64 = vector.broadcast %cst_58 : f32 to vector<8x32xf32>
    %65 = arith.addf %64, %63 : vector<8x32xf32>
    %66 = arith.divf %64, %65 : vector<8x32xf32>
    %67 = vector.extract_strided_slice %55 {offsets = [0, 32], sizes = [8, 32], strides = [1, 1]} : vector<8x96xf32> to vector<8x32xf32>
    %68 = vector.extract_strided_slice %58 {offsets = [0, 32], sizes = [8, 32], strides = [1, 1]} : vector<8x96xf32> to vector<8x32xf32>
    %69 = arith.addf %67, %68 : vector<8x32xf32>
    %70 = arith.negf %69 : vector<8x32xf32>
    %71 = math.exp %70 : vector<8x32xf32>
    %cst_59 = arith.constant 1.000000e+00 : f32
    %72 = vector.broadcast %cst_59 : f32 to vector<8x32xf32>
    %73 = arith.addf %72, %71 : vector<8x32xf32>
    %74 = arith.divf %72, %73 : vector<8x32xf32>
    %75 = vector.extract_strided_slice %55 {offsets = [0, 64], sizes = [8, 32], strides = [1, 1]} : vector<8x96xf32> to vector<8x32xf32>
    %76 = vector.extract_strided_slice %58 {offsets = [0, 64], sizes = [8, 32], strides = [1, 1]} : vector<8x96xf32> to vector<8x32xf32>
    %77 = arith.mulf %66, %76 : vector<8x32xf32>
    %78 = arith.addf %75, %77 : vector<8x32xf32>
    %79 = math.tanh %78 : vector<8x32xf32>
    %cst_60 = arith.constant 1.000000e+00 : f32
    %80 = vector.broadcast %cst_60 : f32 to vector<8x32xf32>
    %81 = arith.subf %80, %74 : vector<8x32xf32>
    %82 = arith.mulf %81, %79 : vector<8x32xf32>
    %83 = arith.mulf %74, %52 : vector<8x32xf32>
    %84 = arith.addf %82, %83 : vector<8x32xf32>
    %cst_61 = arith.constant dense<0.000000e+00> : vector<8x96xf32>
    %85 = tpu.matmul %84, %10, %cst_61 {dimension_numbers = #tpu.dot_dimension_numbers<[1], [0], [0], [1], [0, 0, 1, 1], [], []>} : vector<8x32xf32>, vector<32x96xf32>, vector<8x96xf32> -> vector<8x96xf32>
    %86 = vector.broadcast %12 : vector<1x96xf32> to vector<8x96xf32>
    %87 = arith.addf %85, %86 : vector<8x96xf32>
    %cst_62 = arith.constant dense<0.000000e+00> : vector<8x96xf32>
    %88 = tpu.matmul %54, %11, %cst_62 {dimension_numbers = #tpu.dot_dimension_numbers<[1], [0], [0], [1], [0, 0, 1, 1], [], []>} : vector<8x32xf32>, vector<32x96xf32>, vector<8x96xf32> -> vector<8x96xf32>
    %89 = vector.broadcast %13 : vector<1x96xf32> to vector<8x96xf32>
    %90 = arith.addf %88, %89 : vector<8x96xf32>
    %91 = vector.extract_strided_slice %87 {offsets = [0, 0], sizes = [8, 32], strides = [1, 1]} : vector<8x96xf32> to vector<8x32xf32>
    %92 = vector.extract_strided_slice %90 {offsets = [0, 0], sizes = [8, 32], strides = [1, 1]} : vector<8x96xf32> to vector<8x32xf32>
    %93 = arith.addf %91, %92 : vector<8x32xf32>
    %94 = arith.negf %93 : vector<8x32xf32>
    %95 = math.exp %94 : vector<8x32xf32>
    %cst_63 = arith.constant 1.000000e+00 : f32
    %96 = vector.broadcast %cst_63 : f32 to vector<8x32xf32>
    %97 = arith.addf %96, %95 : vector<8x32xf32>
    %98 = arith.divf %96, %97 : vector<8x32xf32>
    %99 = vector.extract_strided_slice %87 {offsets = [0, 32], sizes = [8, 32], strides = [1, 1]} : vector<8x96xf32> to vector<8x32xf32>
    %100 = vector.extract_strided_slice %90 {offsets = [0, 32], sizes = [8, 32], strides = [1, 1]} : vector<8x96xf32> to vector<8x32xf32>
    %101 = arith.addf %99, %100 : vector<8x32xf32>
    %102 = arith.negf %101 : vector<8x32xf32>
    %103 = math.exp %102 : vector<8x32xf32>
    %cst_64 = arith.constant 1.000000e+00 : f32
    %104 = vector.broadcast %cst_64 : f32 to vector<8x32xf32>
    %105 = arith.addf %104, %103 : vector<8x32xf32>
    %106 = arith.divf %104, %105 : vector<8x32xf32>
    %107 = vector.extract_strided_slice %87 {offsets = [0, 64], sizes = [8, 32], strides = [1, 1]} : vector<8x96xf32> to vector<8x32xf32>
    %108 = vector.extract_strided_slice %90 {offsets = [0, 64], sizes = [8, 32], strides = [1, 1]} : vector<8x96xf32> to vector<8x32xf32>
    %109 = arith.mulf %98, %108 : vector<8x32xf32>
    %110 = arith.addf %107, %109 : vector<8x32xf32>
    %111 = math.tanh %110 : vector<8x32xf32>
    %cst_65 = arith.constant 1.000000e+00 : f32
    %112 = vector.broadcast %cst_65 : f32 to vector<8x32xf32>
    %113 = arith.subf %112, %106 : vector<8x32xf32>
    %114 = arith.mulf %113, %111 : vector<8x32xf32>
    %115 = arith.mulf %106, %54 : vector<8x32xf32>
    %116 = arith.addf %114, %115 : vector<8x32xf32>
    %117 = vector.extract_strided_slice %50 {offsets = [8, 0], sizes = [8, 96], strides = [1, 1]} : vector<32x96xf32> to vector<8x96xf32>
    %cst_66 = arith.constant dense<0.000000e+00> : vector<8x96xf32>
    %118 = tpu.matmul %84, %7, %cst_66 {dimension_numbers = #tpu.dot_dimension_numbers<[1], [0], [0], [1], [0, 0, 1, 1], [], []>} : vector<8x32xf32>, vector<32x96xf32>, vector<8x96xf32> -> vector<8x96xf32>
    %119 = vector.broadcast %9 : vector<1x96xf32> to vector<8x96xf32>
    %120 = arith.addf %118, %119 : vector<8x96xf32>
    %121 = vector.extract_strided_slice %117 {offsets = [0, 0], sizes = [8, 32], strides = [1, 1]} : vector<8x96xf32> to vector<8x32xf32>
    %122 = vector.extract_strided_slice %120 {offsets = [0, 0], sizes = [8, 32], strides = [1, 1]} : vector<8x96xf32> to vector<8x32xf32>
    %123 = arith.addf %121, %122 : vector<8x32xf32>
    %124 = arith.negf %123 : vector<8x32xf32>
    %125 = math.exp %124 : vector<8x32xf32>
    %cst_67 = arith.constant 1.000000e+00 : f32
    %126 = vector.broadcast %cst_67 : f32 to vector<8x32xf32>
    %127 = arith.addf %126, %125 : vector<8x32xf32>
    %128 = arith.divf %126, %127 : vector<8x32xf32>
    %129 = vector.extract_strided_slice %117 {offsets = [0, 32], sizes = [8, 32], strides = [1, 1]} : vector<8x96xf32> to vector<8x32xf32>
    %130 = vector.extract_strided_slice %120 {offsets = [0, 32], sizes = [8, 32], strides = [1, 1]} : vector<8x96xf32> to vector<8x32xf32>
    %131 = arith.addf %129, %130 : vector<8x32xf32>
    %132 = arith.negf %131 : vector<8x32xf32>
    %133 = math.exp %132 : vector<8x32xf32>
    %cst_68 = arith.constant 1.000000e+00 : f32
    %134 = vector.broadcast %cst_68 : f32 to vector<8x32xf32>
    %135 = arith.addf %134, %133 : vector<8x32xf32>
    %136 = arith.divf %134, %135 : vector<8x32xf32>
    %137 = vector.extract_strided_slice %117 {offsets = [0, 64], sizes = [8, 32], strides = [1, 1]} : vector<8x96xf32> to vector<8x32xf32>
    %138 = vector.extract_strided_slice %120 {offsets = [0, 64], sizes = [8, 32], strides = [1, 1]} : vector<8x96xf32> to vector<8x32xf32>
    %139 = arith.mulf %128, %138 : vector<8x32xf32>
    %140 = arith.addf %137, %139 : vector<8x32xf32>
    %141 = math.tanh %140 : vector<8x32xf32>
    %cst_69 = arith.constant 1.000000e+00 : f32
    %142 = vector.broadcast %cst_69 : f32 to vector<8x32xf32>
    %143 = arith.subf %142, %136 : vector<8x32xf32>
    %144 = arith.mulf %143, %141 : vector<8x32xf32>
    %145 = arith.mulf %136, %84 : vector<8x32xf32>
    %146 = arith.addf %144, %145 : vector<8x32xf32>
    %cst_70 = arith.constant dense<0.000000e+00> : vector<8x96xf32>
    %147 = tpu.matmul %146, %10, %cst_70 {dimension_numbers = #tpu.dot_dimension_numbers<[1], [0], [0], [1], [0, 0, 1, 1], [], []>} : vector<8x32xf32>, vector<32x96xf32>, vector<8x96xf32> -> vector<8x96xf32>
    %148 = vector.broadcast %12 : vector<1x96xf32> to vector<8x96xf32>
    %149 = arith.addf %147, %148 : vector<8x96xf32>
    %cst_71 = arith.constant dense<0.000000e+00> : vector<8x96xf32>
    %150 = tpu.matmul %116, %11, %cst_71 {dimension_numbers = #tpu.dot_dimension_numbers<[1], [0], [0], [1], [0, 0, 1, 1], [], []>} : vector<8x32xf32>, vector<32x96xf32>, vector<8x96xf32> -> vector<8x96xf32>
    %151 = vector.broadcast %13 : vector<1x96xf32> to vector<8x96xf32>
    %152 = arith.addf %150, %151 : vector<8x96xf32>
    %153 = vector.extract_strided_slice %149 {offsets = [0, 0], sizes = [8, 32], strides = [1, 1]} : vector<8x96xf32> to vector<8x32xf32>
    %154 = vector.extract_strided_slice %152 {offsets = [0, 0], sizes = [8, 32], strides = [1, 1]} : vector<8x96xf32> to vector<8x32xf32>
    %155 = arith.addf %153, %154 : vector<8x32xf32>
    %156 = arith.negf %155 : vector<8x32xf32>
    %157 = math.exp %156 : vector<8x32xf32>
    %cst_72 = arith.constant 1.000000e+00 : f32
    %158 = vector.broadcast %cst_72 : f32 to vector<8x32xf32>
    %159 = arith.addf %158, %157 : vector<8x32xf32>
    %160 = arith.divf %158, %159 : vector<8x32xf32>
    %161 = vector.extract_strided_slice %149 {offsets = [0, 32], sizes = [8, 32], strides = [1, 1]} : vector<8x96xf32> to vector<8x32xf32>
    %162 = vector.extract_strided_slice %152 {offsets = [0, 32], sizes = [8, 32], strides = [1, 1]} : vector<8x96xf32> to vector<8x32xf32>
    %163 = arith.addf %161, %162 : vector<8x32xf32>
    %164 = arith.negf %163 : vector<8x32xf32>
    %165 = math.exp %164 : vector<8x32xf32>
    %cst_73 = arith.constant 1.000000e+00 : f32
    %166 = vector.broadcast %cst_73 : f32 to vector<8x32xf32>
    %167 = arith.addf %166, %165 : vector<8x32xf32>
    %168 = arith.divf %166, %167 : vector<8x32xf32>
    %169 = vector.extract_strided_slice %149 {offsets = [0, 64], sizes = [8, 32], strides = [1, 1]} : vector<8x96xf32> to vector<8x32xf32>
    %170 = vector.extract_strided_slice %152 {offsets = [0, 64], sizes = [8, 32], strides = [1, 1]} : vector<8x96xf32> to vector<8x32xf32>
    %171 = arith.mulf %160, %170 : vector<8x32xf32>
    %172 = arith.addf %169, %171 : vector<8x32xf32>
    %173 = math.tanh %172 : vector<8x32xf32>
    %cst_74 = arith.constant 1.000000e+00 : f32
    %174 = vector.broadcast %cst_74 : f32 to vector<8x32xf32>
    %175 = arith.subf %174, %168 : vector<8x32xf32>
    %176 = arith.mulf %175, %173 : vector<8x32xf32>
    %177 = arith.mulf %168, %116 : vector<8x32xf32>
    %178 = arith.addf %176, %177 : vector<8x32xf32>
    %179 = vector.extract_strided_slice %50 {offsets = [16, 0], sizes = [8, 96], strides = [1, 1]} : vector<32x96xf32> to vector<8x96xf32>
    %cst_75 = arith.constant dense<0.000000e+00> : vector<8x96xf32>
    %180 = tpu.matmul %146, %7, %cst_75 {dimension_numbers = #tpu.dot_dimension_numbers<[1], [0], [0], [1], [0, 0, 1, 1], [], []>} : vector<8x32xf32>, vector<32x96xf32>, vector<8x96xf32> -> vector<8x96xf32>
    %181 = vector.broadcast %9 : vector<1x96xf32> to vector<8x96xf32>
    %182 = arith.addf %180, %181 : vector<8x96xf32>
    %183 = vector.extract_strided_slice %179 {offsets = [0, 0], sizes = [8, 32], strides = [1, 1]} : vector<8x96xf32> to vector<8x32xf32>
    %184 = vector.extract_strided_slice %182 {offsets = [0, 0], sizes = [8, 32], strides = [1, 1]} : vector<8x96xf32> to vector<8x32xf32>
    %185 = arith.addf %183, %184 : vector<8x32xf32>
    %186 = arith.negf %185 : vector<8x32xf32>
    %187 = math.exp %186 : vector<8x32xf32>
    %cst_76 = arith.constant 1.000000e+00 : f32
    %188 = vector.broadcast %cst_76 : f32 to vector<8x32xf32>
    %189 = arith.addf %188, %187 : vector<8x32xf32>
    %190 = arith.divf %188, %189 : vector<8x32xf32>
    %191 = vector.extract_strided_slice %179 {offsets = [0, 32], sizes = [8, 32], strides = [1, 1]} : vector<8x96xf32> to vector<8x32xf32>
    %192 = vector.extract_strided_slice %182 {offsets = [0, 32], sizes = [8, 32], strides = [1, 1]} : vector<8x96xf32> to vector<8x32xf32>
    %193 = arith.addf %191, %192 : vector<8x32xf32>
    %194 = arith.negf %193 : vector<8x32xf32>
    %195 = math.exp %194 : vector<8x32xf32>
    %cst_77 = arith.constant 1.000000e+00 : f32
    %196 = vector.broadcast %cst_77 : f32 to vector<8x32xf32>
    %197 = arith.addf %196, %195 : vector<8x32xf32>
    %198 = arith.divf %196, %197 : vector<8x32xf32>
    %199 = vector.extract_strided_slice %179 {offsets = [0, 64], sizes = [8, 32], strides = [1, 1]} : vector<8x96xf32> to vector<8x32xf32>
    %200 = vector.extract_strided_slice %182 {offsets = [0, 64], sizes = [8, 32], strides = [1, 1]} : vector<8x96xf32> to vector<8x32xf32>
    %201 = arith.mulf %190, %200 : vector<8x32xf32>
    %202 = arith.addf %199, %201 : vector<8x32xf32>
    %203 = math.tanh %202 : vector<8x32xf32>
    %cst_78 = arith.constant 1.000000e+00 : f32
    %204 = vector.broadcast %cst_78 : f32 to vector<8x32xf32>
    %205 = arith.subf %204, %198 : vector<8x32xf32>
    %206 = arith.mulf %205, %203 : vector<8x32xf32>
    %207 = arith.mulf %198, %146 : vector<8x32xf32>
    %208 = arith.addf %206, %207 : vector<8x32xf32>
    %cst_79 = arith.constant dense<0.000000e+00> : vector<8x96xf32>
    %209 = tpu.matmul %208, %10, %cst_79 {dimension_numbers = #tpu.dot_dimension_numbers<[1], [0], [0], [1], [0, 0, 1, 1], [], []>} : vector<8x32xf32>, vector<32x96xf32>, vector<8x96xf32> -> vector<8x96xf32>
    %210 = vector.broadcast %12 : vector<1x96xf32> to vector<8x96xf32>
    %211 = arith.addf %209, %210 : vector<8x96xf32>
    %cst_80 = arith.constant dense<0.000000e+00> : vector<8x96xf32>
    %212 = tpu.matmul %178, %11, %cst_80 {dimension_numbers = #tpu.dot_dimension_numbers<[1], [0], [0], [1], [0, 0, 1, 1], [], []>} : vector<8x32xf32>, vector<32x96xf32>, vector<8x96xf32> -> vector<8x96xf32>
    %213 = vector.broadcast %13 : vector<1x96xf32> to vector<8x96xf32>
    %214 = arith.addf %212, %213 : vector<8x96xf32>
    %215 = vector.extract_strided_slice %211 {offsets = [0, 0], sizes = [8, 32], strides = [1, 1]} : vector<8x96xf32> to vector<8x32xf32>
    %216 = vector.extract_strided_slice %214 {offsets = [0, 0], sizes = [8, 32], strides = [1, 1]} : vector<8x96xf32> to vector<8x32xf32>
    %217 = arith.addf %215, %216 : vector<8x32xf32>
    %218 = arith.negf %217 : vector<8x32xf32>
    %219 = math.exp %218 : vector<8x32xf32>
    %cst_81 = arith.constant 1.000000e+00 : f32
    %220 = vector.broadcast %cst_81 : f32 to vector<8x32xf32>
    %221 = arith.addf %220, %219 : vector<8x32xf32>
    %222 = arith.divf %220, %221 : vector<8x32xf32>
    %223 = vector.extract_strided_slice %211 {offsets = [0, 32], sizes = [8, 32], strides = [1, 1]} : vector<8x96xf32> to vector<8x32xf32>
    %224 = vector.extract_strided_slice %214 {offsets = [0, 32], sizes = [8, 32], strides = [1, 1]} : vector<8x96xf32> to vector<8x32xf32>
    %225 = arith.addf %223, %224 : vector<8x32xf32>
    %226 = arith.negf %225 : vector<8x32xf32>
    %227 = math.exp %226 : vector<8x32xf32>
    %cst_82 = arith.constant 1.000000e+00 : f32
    %228 = vector.broadcast %cst_82 : f32 to vector<8x32xf32>
    %229 = arith.addf %228, %227 : vector<8x32xf32>
    %230 = arith.divf %228, %229 : vector<8x32xf32>
    %231 = vector.extract_strided_slice %211 {offsets = [0, 64], sizes = [8, 32], strides = [1, 1]} : vector<8x96xf32> to vector<8x32xf32>
    %232 = vector.extract_strided_slice %214 {offsets = [0, 64], sizes = [8, 32], strides = [1, 1]} : vector<8x96xf32> to vector<8x32xf32>
    %233 = arith.mulf %222, %232 : vector<8x32xf32>
    %234 = arith.addf %231, %233 : vector<8x32xf32>
    %235 = math.tanh %234 : vector<8x32xf32>
    %cst_83 = arith.constant 1.000000e+00 : f32
    %236 = vector.broadcast %cst_83 : f32 to vector<8x32xf32>
    %237 = arith.subf %236, %230 : vector<8x32xf32>
    %238 = arith.mulf %237, %235 : vector<8x32xf32>
    %239 = arith.mulf %230, %178 : vector<8x32xf32>
    %240 = arith.addf %238, %239 : vector<8x32xf32>
    %241 = vector.extract_strided_slice %50 {offsets = [24, 0], sizes = [8, 96], strides = [1, 1]} : vector<32x96xf32> to vector<8x96xf32>
    %cst_84 = arith.constant dense<0.000000e+00> : vector<8x96xf32>
    %242 = tpu.matmul %208, %7, %cst_84 {dimension_numbers = #tpu.dot_dimension_numbers<[1], [0], [0], [1], [0, 0, 1, 1], [], []>} : vector<8x32xf32>, vector<32x96xf32>, vector<8x96xf32> -> vector<8x96xf32>
    %243 = vector.broadcast %9 : vector<1x96xf32> to vector<8x96xf32>
    %244 = arith.addf %242, %243 : vector<8x96xf32>
    %245 = vector.extract_strided_slice %241 {offsets = [0, 0], sizes = [8, 32], strides = [1, 1]} : vector<8x96xf32> to vector<8x32xf32>
    %246 = vector.extract_strided_slice %244 {offsets = [0, 0], sizes = [8, 32], strides = [1, 1]} : vector<8x96xf32> to vector<8x32xf32>
    %247 = arith.addf %245, %246 : vector<8x32xf32>
    %248 = arith.negf %247 : vector<8x32xf32>
    %249 = math.exp %248 : vector<8x32xf32>
    %cst_85 = arith.constant 1.000000e+00 : f32
    %250 = vector.broadcast %cst_85 : f32 to vector<8x32xf32>
    %251 = arith.addf %250, %249 : vector<8x32xf32>
    %252 = arith.divf %250, %251 : vector<8x32xf32>
    %253 = vector.extract_strided_slice %241 {offsets = [0, 32], sizes = [8, 32], strides = [1, 1]} : vector<8x96xf32> to vector<8x32xf32>
    %254 = vector.extract_strided_slice %244 {offsets = [0, 32], sizes = [8, 32], strides = [1, 1]} : vector<8x96xf32> to vector<8x32xf32>
    %255 = arith.addf %253, %254 : vector<8x32xf32>
    %256 = arith.negf %255 : vector<8x32xf32>
    %257 = math.exp %256 : vector<8x32xf32>
    %cst_86 = arith.constant 1.000000e+00 : f32
    %258 = vector.broadcast %cst_86 : f32 to vector<8x32xf32>
    %259 = arith.addf %258, %257 : vector<8x32xf32>
    %260 = arith.divf %258, %259 : vector<8x32xf32>
    %261 = vector.extract_strided_slice %241 {offsets = [0, 64], sizes = [8, 32], strides = [1, 1]} : vector<8x96xf32> to vector<8x32xf32>
    %262 = vector.extract_strided_slice %244 {offsets = [0, 64], sizes = [8, 32], strides = [1, 1]} : vector<8x96xf32> to vector<8x32xf32>
    %263 = arith.mulf %252, %262 : vector<8x32xf32>
    %264 = arith.addf %261, %263 : vector<8x32xf32>
    %265 = math.tanh %264 : vector<8x32xf32>
    %cst_87 = arith.constant 1.000000e+00 : f32
    %266 = vector.broadcast %cst_87 : f32 to vector<8x32xf32>
    %267 = arith.subf %266, %260 : vector<8x32xf32>
    %268 = arith.mulf %267, %265 : vector<8x32xf32>
    %269 = arith.mulf %260, %208 : vector<8x32xf32>
    %270 = arith.addf %268, %269 : vector<8x32xf32>
    %cst_88 = arith.constant dense<0.000000e+00> : vector<8x96xf32>
    %271 = tpu.matmul %270, %10, %cst_88 {dimension_numbers = #tpu.dot_dimension_numbers<[1], [0], [0], [1], [0, 0, 1, 1], [], []>} : vector<8x32xf32>, vector<32x96xf32>, vector<8x96xf32> -> vector<8x96xf32>
    %272 = vector.broadcast %12 : vector<1x96xf32> to vector<8x96xf32>
    %273 = arith.addf %271, %272 : vector<8x96xf32>
    %cst_89 = arith.constant dense<0.000000e+00> : vector<8x96xf32>
    %274 = tpu.matmul %240, %11, %cst_89 {dimension_numbers = #tpu.dot_dimension_numbers<[1], [0], [0], [1], [0, 0, 1, 1], [], []>} : vector<8x32xf32>, vector<32x96xf32>, vector<8x96xf32> -> vector<8x96xf32>
    %275 = vector.broadcast %13 : vector<1x96xf32> to vector<8x96xf32>
    %276 = arith.addf %274, %275 : vector<8x96xf32>
    %277 = vector.extract_strided_slice %273 {offsets = [0, 0], sizes = [8, 32], strides = [1, 1]} : vector<8x96xf32> to vector<8x32xf32>
    %278 = vector.extract_strided_slice %276 {offsets = [0, 0], sizes = [8, 32], strides = [1, 1]} : vector<8x96xf32> to vector<8x32xf32>
    %279 = arith.addf %277, %278 : vector<8x32xf32>
    %280 = arith.negf %279 : vector<8x32xf32>
    %281 = math.exp %280 : vector<8x32xf32>
    %cst_90 = arith.constant 1.000000e+00 : f32
    %282 = vector.broadcast %cst_90 : f32 to vector<8x32xf32>
    %283 = arith.addf %282, %281 : vector<8x32xf32>
    %284 = arith.divf %282, %283 : vector<8x32xf32>
    %285 = vector.extract_strided_slice %273 {offsets = [0, 32], sizes = [8, 32], strides = [1, 1]} : vector<8x96xf32> to vector<8x32xf32>
    %286 = vector.extract_strided_slice %276 {offsets = [0, 32], sizes = [8, 32], strides = [1, 1]} : vector<8x96xf32> to vector<8x32xf32>
    %287 = arith.addf %285, %286 : vector<8x32xf32>
    %288 = arith.negf %287 : vector<8x32xf32>
    %289 = math.exp %288 : vector<8x32xf32>
    %cst_91 = arith.constant 1.000000e+00 : f32
    %290 = vector.broadcast %cst_91 : f32 to vector<8x32xf32>
    %291 = arith.addf %290, %289 : vector<8x32xf32>
    %292 = arith.divf %290, %291 : vector<8x32xf32>
    %293 = vector.extract_strided_slice %273 {offsets = [0, 64], sizes = [8, 32], strides = [1, 1]} : vector<8x96xf32> to vector<8x32xf32>
    %294 = vector.extract_strided_slice %276 {offsets = [0, 64], sizes = [8, 32], strides = [1, 1]} : vector<8x96xf32> to vector<8x32xf32>
    %295 = arith.mulf %284, %294 : vector<8x32xf32>
    %296 = arith.addf %293, %295 : vector<8x32xf32>
    %297 = math.tanh %296 : vector<8x32xf32>
    %cst_92 = arith.constant 1.000000e+00 : f32
    %298 = vector.broadcast %cst_92 : f32 to vector<8x32xf32>
    %299 = arith.subf %298, %292 : vector<8x32xf32>
    %300 = arith.mulf %299, %297 : vector<8x32xf32>
    %301 = arith.mulf %292, %240 : vector<8x32xf32>
    %302 = arith.addf %300, %301 : vector<8x32xf32>
    %c0_93 = arith.constant 0 : index
    %c0_94 = arith.constant 0 : index
    %303 = vector.load %arg2[%c0_93, %c0_94] : memref<8x1xf32, #tpu.memory_space<vmem>>, vector<8x1xf32>
    %304 = vector.broadcast %303 : vector<8x1xf32> to vector<8x96xf32>
    %305 = vector.broadcast %14 : vector<1x96xf32> to vector<8x96xf32>
    %306 = arith.mulf %304, %305 : vector<8x96xf32>
    %307 = vector.broadcast %16 : vector<1x96xf32> to vector<8x96xf32>
    %308 = arith.addf %306, %307 : vector<8x96xf32>
    %cst_95 = arith.constant dense<0.000000e+00> : vector<8x96xf32>
    %309 = tpu.matmul %270, %15, %cst_95 {dimension_numbers = #tpu.dot_dimension_numbers<[1], [0], [0], [1], [0, 0, 1, 1], [], []>} : vector<8x32xf32>, vector<32x96xf32>, vector<8x96xf32> -> vector<8x96xf32>
    %310 = vector.broadcast %17 : vector<1x96xf32> to vector<8x96xf32>
    %311 = arith.addf %309, %310 : vector<8x96xf32>
    %312 = vector.extract_strided_slice %308 {offsets = [0, 0], sizes = [8, 32], strides = [1, 1]} : vector<8x96xf32> to vector<8x32xf32>
    %313 = vector.extract_strided_slice %311 {offsets = [0, 0], sizes = [8, 32], strides = [1, 1]} : vector<8x96xf32> to vector<8x32xf32>
    %314 = arith.addf %312, %313 : vector<8x32xf32>
    %315 = arith.negf %314 : vector<8x32xf32>
    %316 = math.exp %315 : vector<8x32xf32>
    %cst_96 = arith.constant 1.000000e+00 : f32
    %317 = vector.broadcast %cst_96 : f32 to vector<8x32xf32>
    %318 = arith.addf %317, %316 : vector<8x32xf32>
    %319 = arith.divf %317, %318 : vector<8x32xf32>
    %320 = vector.extract_strided_slice %308 {offsets = [0, 32], sizes = [8, 32], strides = [1, 1]} : vector<8x96xf32> to vector<8x32xf32>
    %321 = vector.extract_strided_slice %311 {offsets = [0, 32], sizes = [8, 32], strides = [1, 1]} : vector<8x96xf32> to vector<8x32xf32>
    %322 = arith.addf %320, %321 : vector<8x32xf32>
    %323 = arith.negf %322 : vector<8x32xf32>
    %324 = math.exp %323 : vector<8x32xf32>
    %cst_97 = arith.constant 1.000000e+00 : f32
    %325 = vector.broadcast %cst_97 : f32 to vector<8x32xf32>
    %326 = arith.addf %325, %324 : vector<8x32xf32>
    %327 = arith.divf %325, %326 : vector<8x32xf32>
    %328 = vector.extract_strided_slice %308 {offsets = [0, 64], sizes = [8, 32], strides = [1, 1]} : vector<8x96xf32> to vector<8x32xf32>
    %329 = vector.extract_strided_slice %311 {offsets = [0, 64], sizes = [8, 32], strides = [1, 1]} : vector<8x96xf32> to vector<8x32xf32>
    %330 = arith.mulf %319, %329 : vector<8x32xf32>
    %331 = arith.addf %328, %330 : vector<8x32xf32>
    %332 = math.tanh %331 : vector<8x32xf32>
    %cst_98 = arith.constant 1.000000e+00 : f32
    %333 = vector.broadcast %cst_98 : f32 to vector<8x32xf32>
    %334 = arith.subf %333, %327 : vector<8x32xf32>
    %335 = arith.mulf %334, %332 : vector<8x32xf32>
    %336 = arith.mulf %327, %270 : vector<8x32xf32>
    %337 = arith.addf %335, %336 : vector<8x32xf32>
    %cst_99 = arith.constant dense<0.000000e+00> : vector<8x96xf32>
    %338 = tpu.matmul %337, %18, %cst_99 {dimension_numbers = #tpu.dot_dimension_numbers<[1], [0], [0], [1], [0, 0, 1, 1], [], []>} : vector<8x32xf32>, vector<32x96xf32>, vector<8x96xf32> -> vector<8x96xf32>
    %339 = vector.broadcast %20 : vector<1x96xf32> to vector<8x96xf32>
    %340 = arith.addf %338, %339 : vector<8x96xf32>
    %cst_100 = arith.constant dense<0.000000e+00> : vector<8x96xf32>
    %341 = tpu.matmul %302, %19, %cst_100 {dimension_numbers = #tpu.dot_dimension_numbers<[1], [0], [0], [1], [0, 0, 1, 1], [], []>} : vector<8x32xf32>, vector<32x96xf32>, vector<8x96xf32> -> vector<8x96xf32>
    %342 = vector.broadcast %21 : vector<1x96xf32> to vector<8x96xf32>
    %343 = arith.addf %341, %342 : vector<8x96xf32>
    %344 = vector.extract_strided_slice %340 {offsets = [0, 0], sizes = [8, 32], strides = [1, 1]} : vector<8x96xf32> to vector<8x32xf32>
    %345 = vector.extract_strided_slice %343 {offsets = [0, 0], sizes = [8, 32], strides = [1, 1]} : vector<8x96xf32> to vector<8x32xf32>
    %346 = arith.addf %344, %345 : vector<8x32xf32>
    %347 = arith.negf %346 : vector<8x32xf32>
    %348 = math.exp %347 : vector<8x32xf32>
    %cst_101 = arith.constant 1.000000e+00 : f32
    %349 = vector.broadcast %cst_101 : f32 to vector<8x32xf32>
    %350 = arith.addf %349, %348 : vector<8x32xf32>
    %351 = arith.divf %349, %350 : vector<8x32xf32>
    %352 = vector.extract_strided_slice %340 {offsets = [0, 32], sizes = [8, 32], strides = [1, 1]} : vector<8x96xf32> to vector<8x32xf32>
    %353 = vector.extract_strided_slice %343 {offsets = [0, 32], sizes = [8, 32], strides = [1, 1]} : vector<8x96xf32> to vector<8x32xf32>
    %354 = arith.addf %352, %353 : vector<8x32xf32>
    %355 = arith.negf %354 : vector<8x32xf32>
    %356 = math.exp %355 : vector<8x32xf32>
    %cst_102 = arith.constant 1.000000e+00 : f32
    %357 = vector.broadcast %cst_102 : f32 to vector<8x32xf32>
    %358 = arith.addf %357, %356 : vector<8x32xf32>
    %359 = arith.divf %357, %358 : vector<8x32xf32>
    %360 = vector.extract_strided_slice %340 {offsets = [0, 64], sizes = [8, 32], strides = [1, 1]} : vector<8x96xf32> to vector<8x32xf32>
    %361 = vector.extract_strided_slice %343 {offsets = [0, 64], sizes = [8, 32], strides = [1, 1]} : vector<8x96xf32> to vector<8x32xf32>
    %362 = arith.mulf %351, %361 : vector<8x32xf32>
    %363 = arith.addf %360, %362 : vector<8x32xf32>
    %364 = math.tanh %363 : vector<8x32xf32>
    %cst_103 = arith.constant 1.000000e+00 : f32
    %365 = vector.broadcast %cst_103 : f32 to vector<8x32xf32>
    %366 = arith.subf %365, %359 : vector<8x32xf32>
    %367 = arith.mulf %366, %364 : vector<8x32xf32>
    %368 = arith.mulf %359, %302 : vector<8x32xf32>
    %369 = arith.addf %367, %368 : vector<8x32xf32>
    %370 = arith.addf %116, %369 : vector<8x32xf32>
    %371 = arith.addf %178, %369 : vector<8x32xf32>
    %372 = arith.addf %240, %369 : vector<8x32xf32>
    %373 = arith.addf %302, %369 : vector<8x32xf32>
    %374 = tpu.concatenate %370, %371, %372, %373 in 0 : vector<8x32xf32>, vector<8x32xf32>, vector<8x32xf32>, vector<8x32xf32> -> vector<32x32xf32>
    %cst_104 = arith.constant dense<0.000000e+00> : vector<32x2xf32>
    %375 = tpu.matmul %374, %2, %cst_104 {dimension_numbers = #tpu.dot_dimension_numbers<[1], [0], [0], [1], [0, 0, 1, 1], [], []>} : vector<32x32xf32>, vector<32x2xf32>, vector<32x2xf32> -> vector<32x2xf32>
    %376 = vector.broadcast %5 : vector<1x2xf32> to vector<32x2xf32>
    %377 = arith.addf %375, %376 : vector<32x2xf32>
    %378 = vector.shape_cast %377 : vector<32x2xf32> to vector<4x8x2xf32>
    %c0_105 = arith.constant 0 : index
    %c0_106 = arith.constant 0 : index
    %c0_107 = arith.constant 0 : index
    %379 = vector.load %arg26[%c0_105, %c0_106, %c0_107] : memref<4x8x2xf32, #tpu.memory_space<vmem>>, vector<4x8x2xf32>
    tpu.vector_store %arg26[%c0_105, %c0_106, %c0_107], %378 {strides = array<i32>} : memref<4x8x2xf32, #tpu.memory_space<vmem>>, vector<4x8x2xf32>,
    %380 = vector.shape_cast %337 : vector<8x32xf32> to vector<1x8x32xf32>
    %381 = vector.shape_cast %369 : vector<8x32xf32> to vector<1x8x32xf32>
    %382 = tpu.concatenate %380, %381 in 0 : vector<1x8x32xf32>, vector<1x8x32xf32> -> vector<2x8x32xf32>
    %c0_108 = arith.constant 0 : index
    %c0_109 = arith.constant 0 : index
    %c0_110 = arith.constant 0 : index
    %383 = vector.load %arg27[%c0_108, %c0_109, %c0_110] : memref<2x8x32xf32, #tpu.memory_space<vmem>>, vector<2x8x32xf32>
    tpu.vector_store %arg27[%c0_108, %c0_109, %c0_110], %382 {strides = array<i32>} : memref<2x8x32xf32, #tpu.memory_space<vmem>>, vector<2x8x32xf32>,
    return
  }
}

</mosaic_0001>

<bundles_post_ra>
// kernel: tpu_custom_call.1
= control target key start
LH: loop header
LB: loop body
LE: loop exit
PB: predicated region body
PF: predicated region fallthrough
CT: control target
= control target key end

     0   :  { %s3805_s0 = inlined_call_operand.vmem [shape: f32[3,8,2], index: 0, kind: input, shape index: {}]   ;;  %s3806_s1 = inlined_call_operand.hbm [shape: f32[8,5], index: 1, kind: input, shape index: {}]   ;;  %s3807_s2 = inlined_call_operand.vmem [shape: f32[8,1], index: 2, kind: input, shape index: {}]   ;;  %s3808_s3 = inlined_call_operand.hbm [shape: f32[2,8,32], index: 3, kind: input, shape index: {}]   ;;  %s3809_s4 = inlined_call_operand.hbm [shape: f32[2,16], index: 4, kind: input, shape index: {}]   ;;  %s3810_s5 = inlined_call_operand.hbm [shape: f32[1,16], index: 5, kind: input, shape index: {}]   ;;  %s3811_s6 = inlined_call_operand.hbm [shape: f32[5,16], index: 6, kind: input, shape index: {}]   ;;  %s3812_s7 = inlined_call_operand.hbm [shape: f32[1,16], index: 7, kind: input, shape index: {}]   ;;  %s3813_s8 = inlined_call_operand.vmem [shape: f32[32,2], index: 8, kind: input, shape index: {}]   ;;  %s3814_s9 = inlined_call_operand.hbm [shape: f32[1,2], index: 9, kind: input, shape index: {}]   ;;  %s3815_s10 = inlined_call_operand.hbm [shape: f32[16,96], index: 10, kind: input, shape index: {}]   ;;  %s3816_s11 = inlined_call_operand.vmem [shape: f32[32,96], index: 11, kind: input, shape index: {}]   ;;  %s3817_s12 = inlined_call_operand.hbm [shape: f32[1,96], index: 12, kind: input, shape index: {}]   ;;  %s3818_s13 = inlined_call_operand.hbm [shape: f32[1,96], index: 13, kind: input, shape index: {}]   ;;  %s3819_s14 = inlined_call_operand.vmem [shape: f32[32,96], index: 14, kind: input, shape index: {}]   ;;  %s3820_s15 = inlined_call_operand.vmem [shape: f32[32,96], index: 15, kind: input, shape index: {}]   ;;  %s3821_s16 = inlined_call_operand.hbm [shape: f32[1,96], index: 16, kind: input, shape index: {}]   ;;  %s3822_s17 = inlined_call_operand.hbm [shape: f32[1,96], index: 17, kind: input, shape index: {}]   ;;  %s3823_s18 = inlined_call_operand.hbm [shape: f32[1,96], index: 18, kind: input, shape index: {}]   ;;  %s3824_s19 = inlined_call_operand.vmem [shape: f32[32,96], index: 19, kind: input, shape index: {}]   ;;  %s3825_s20 = inlined_call_operand.hbm [shape: f32[1,96], index: 20, kind: input, shape index: {}]   ;;  %s3826_s21 = inlined_call_operand.hbm [shape: f32[1,96], index: 21, kind: input, shape index: {}]   ;;  %s3827_s22 = inlined_call_operand.hbm [shape: f32[32,96], index: 22, kind: input, shape index: {}]   ;;  %s3828_s23 = inlined_call_operand.vmem [shape: f32[32,96], index: 23, kind: input, shape index: {}]   ;;  %s3829_s24 = inlined_call_operand.vmem [shape: f32[1,96], index: 24, kind: input, shape index: {}]   ;;  %s3830_s25 = inlined_call_operand.vmem [shape: f32[1,96], index: 25, kind: input, shape index: {}]   ;;  %s3831_s26 = inlined_call_operand.vmem [shape: f32[4,8,2], index: 26, kind: output, shape index: {0}]   ;;  %s3832_s27 = inlined_call_operand.hbm [shape: f32[2,8,32], index: 27, kind: output, shape index: {1}]  }
   0x1   :  { %3846 = sst [smem:[#allocation39_spill]] %s3805_s0 }
   0x2   :  { %3847 = sst [smem:[#allocation40_spill]] %s3806_s1 }
   0x3   :  { %3848 = sst [smem:[#allocation41_spill]] %s3807_s2 }
   0x4   :  { %3849 = sst [smem:[#allocation42_spill]] %s3808_s3 }
   0x5   :  { %3850 = sst [smem:[#allocation43_spill]] %s3809_s4 }
   0x6   :  { %3851 = sst [smem:[#allocation44_spill]] %s3810_s5 }
   0x7   :  { %3852 = sst [smem:[#allocation45_spill]] %s3811_s6 }
   0x8   :  { %3853 = sst [smem:[#allocation46_spill]] %s3812_s7 }
   0x9   :  { %3854 = sst [smem:[#allocation47_spill]] %s3813_s8 }
   0xa   :  { %3855 = sst [smem:[#allocation48_spill]] %s3814_s9 }
   0xb   :  { %3856 = sst [smem:[#allocation49_spill]] %s3815_s10 }
   0xc   :  { %3857 = sst [smem:[#allocation50_spill]] %s3816_s11 }
   0xd   :  { %3858 = sst [smem:[#allocation51_spill]] %s3829_s24 }
   0xe   :  { %3859 = sst [smem:[#allocation52_spill]] %s3831_s26 }
   0xf   :  { %3860 = sst [smem:[#allocation53_spill]] %s3832_s27 }
  0x10   :  { %33 = vsyncpa [#allocation3], 0 }
  0x11   :  { %34 = vsyncpa [#allocation6], 0 }
  0x12   :  { %35 = vsyncpa [#allocation9], 0 }
  0x13   :  { %36 = vsyncpa [#allocation12], 0 }
  0x14   :  { %37 = vsyncpa [#allocation15], 0 }
  0x15   :  { %38 = vsyncpa [#allocation18], 0 }
  0x16   :  { %39 = vsyncpa [#allocation21], 0 }
  0x17   :  { %40 = vsyncpa [#allocation24], 0 }
  0x18   :  { %41 = vsyncpa [#allocation27], 0 }
  0x19   :  { %42 = vsyncpa [#allocation4], 0  ;;  %s3074_s7 = smov [#allocation5]   ;;  %s3861_s9 = sld [smem:[#allocation42_spill]] }
  0x1a   :  { %s62_s4 = sshll.u32 %s3074_s7, 4  ;;  %s63_s4 = int_to_ptr.vmem [resolvable:$true] %s62_s4 }
  0x1f   :  { %s2680_s5 = scalar_lea.hbm %s3861_s9, 256 }
  0x20   :  { %p2681_p0 = scmp.ne.s32.totalorder %s3861_s9, %s2680_s5  ;;  %p2684_p1 = scmp.lt.u32.totalorder %s2680_s5, %s3861_s9 }
  0x22   :  { %p2686_p2 = pnand %p2684_p1, %p2681_p0 }
  0x24   :  { %2689 = shalt.err (!%p2686_p2)
}
  0x25   :  { %s2690_s1 = scalar_lea.vmem %s63_s4, 256  ;;  %p2695_p4 = scmp.lt.s32.totalorder %s63_s4, %s63_s4 }
  0x26   :  { %p2691_p3 = scmp.ne.s32.totalorder %s63_s4, %s2690_s1  ;;  %p2696_p5 = scmp.lt.s32.totalorder %s2690_s1, %s2690_s1 }
  0x28   :  { %p2697_p6 = por %p2696_p5, %p2695_p4 }
  0x2a   :  { %p2698_p7 = pnand %p2697_p6, %p2691_p3 }
  0x2c   :  { %2701 = shalt.err (!%p2698_p7)
}
  0x2d   :  { %s3075_s6 = smov 128   ;;  %s3076_s11 = smov 8  }
  0x2e   :  { %68 = dma.hbm_to_vmem [thread:$0]  %s3861_s9, 256, %s63_s4, [#allocation6], %s3075_s6, %s3075_s6, %s3076_s11  }
  0x2f   :  { %s3077_s7 = smov [#allocation8]   ;;  %s3078_s30 = smov [#allocation11]  }
  0x30   :  { %s85_s8 = sshll.u32 %s3077_s7, 4  ;;  %s105_s5 = sshll.u32 %s3078_s30, 4  ;;  %s86_s8 = int_to_ptr.vmem [resolvable:$true] %s85_s8  ;;  %s106_s5 = int_to_ptr.vmem [resolvable:$true] %s105_s5 }
  0x31   :  { %s3862_s10 = sld [smem:[#allocation44_spill]] }
  0x37   :  { %s2702_s29 = scalar_lea.hbm %s3862_s10, 16 }
  0x38   :  { %p2703_p8 = scmp.ne.s32.totalorder %s3862_s10, %s2702_s29  ;;  %p2706_p9 = scmp.lt.u32.totalorder %s2702_s29, %s3862_s10 }
  0x3a   :  { %p2708_p10 = pnand %p2706_p9, %p2703_p8 }
  0x3c   :  { %2711 = shalt.err (!%p2708_p10)
}
  0x3d   :  { %s2712_s4 = scalar_lea.vmem %s86_s8, 16  ;;  %s2716_s9 = scalar_lea.vmem %s86_s8, 32 }
  0x3e   :  { %p2713_p11 = scmp.ne.s32.totalorder %s86_s8, %s2712_s4  ;;  %p2717_p12 = scmp.lt.s32.totalorder %s86_s8, %s86_s8 }
  0x3f   :  { %p2718_p13 = scmp.lt.s32.totalorder %s2716_s9, %s2712_s4 }
  0x41   :  { %p2719_p0 = por %p2718_p13, %p2717_p12 }
  0x43   :  { %p2720_p1 = pnand %p2719_p0, %p2713_p11 }
  0x45   :  { %2723 = shalt.err (!%p2720_p1)
}
  0x46   :  { %88 = dma.hbm_to_vmem [thread:$0]  %s3862_s10, 16, %s86_s8, [#allocation9]  }
  0x47   :  { %s3863_s30 = sld [smem:[#allocation46_spill]] }
  0x4d   :  { %s2724_s24 = scalar_lea.hbm %s3863_s30, 16 }
  0x4e   :  { %p2725_p2 = scmp.ne.s32.totalorder %s3863_s30, %s2724_s24  ;;  %p2728_p3 = scmp.lt.u32.totalorder %s2724_s24, %s3863_s30 }
  0x50   :  { %p2730_p4 = pnand %p2728_p3, %p2725_p2 }
  0x52   :  { %2733 = shalt.err (!%p2730_p4)
}
  0x53   :  { %s2734_s1 = scalar_lea.vmem %s106_s5, 16  ;;  %s2738_s4 = scalar_lea.vmem %s106_s5, 32 }
  0x54   :  { %p2735_p5 = scmp.ne.s32.totalorder %s106_s5, %s2734_s1  ;;  %p2739_p6 = scmp.lt.s32.totalorder %s106_s5, %s106_s5 }
  0x55   :  { %p2740_p7 = scmp.lt.s32.totalorder %s2738_s4, %s2734_s1 }
  0x57   :  { %p2741_p8 = por %p2740_p7, %p2739_p6 }
  0x59   :  { %p2742_p9 = pnand %p2741_p8, %p2735_p5 }
  0x5b   :  { %2745 = shalt.err (!%p2742_p9)
}
  0x5c   :  { %108 = dma.hbm_to_vmem [thread:$0]  %s3863_s30, 16, %s106_s5, [#allocation12]  }
  0x5d   :  { %s3079_s9 = smov [#allocation14]   ;;  %s3080_s3 = smov [#allocation17]  }
  0x5e   :  { %s126_s2 = sshll.u32 %s3079_s9, 4  ;;  %s151_s26 = sshll.u32 %s3080_s3, 4  ;;  %s127_s2 = int_to_ptr.vmem [resolvable:$true] %s126_s2  ;;  %s152_s26 = int_to_ptr.vmem [resolvable:$true] %s151_s26 }
  0x5f   :  { %s3864_s27 = sld [smem:[#allocation49_spill]] }
  0x65   :  { %s2746_s28 = scalar_lea.hbm %s3864_s27, 256 }
  0x66   :  { %p2747_p10 = scmp.ne.s32.totalorder %s3864_s27, %s2746_s28  ;;  %p2750_p11 = scmp.lt.u32.totalorder %s2746_s28, %s3864_s27 }
  0x68   :  { %p2752_p12 = pnand %p2750_p11, %p2747_p10 }
  0x6a   :  { %2755 = shalt.err (!%p2752_p12)
}
  0x6b   :  { %s2756_s5 = scalar_lea.vmem %s127_s2, 256  ;;  %p2761_p0 = scmp.lt.s32.totalorder %s127_s2, %s127_s2 }
  0x6c   :  { %p2757_p13 = scmp.ne.s32.totalorder %s127_s2, %s2756_s5  ;;  %p2762_p1 = scmp.lt.s32.totalorder %s2756_s5, %s2756_s5 }
  0x6e   :  { %p2763_p2 = por %p2762_p1, %p2761_p0 }
  0x70   :  { %p2764_p3 = pnand %p2763_p2, %p2757_p13 }
  0x72   :  { %2767 = shalt.err (!%p2764_p3)
}
  0x73   :  { %132 = dma.hbm_to_vmem [thread:$0]  %s3864_s27, 256, %s127_s2, [#allocation15], %s3075_s6, %s3075_s6, %s3076_s11  }
  0x74   :  { %s2768_s3 = scalar_lea.hbm %s3818_s13, 16 }
  0x75   :  { %p2769_p4 = scmp.ne.s32.totalorder %s3818_s13, %s2768_s3  ;;  %p2772_p5 = scmp.lt.u32.totalorder %s2768_s3, %s3818_s13 }
  0x77   :  { %p2774_p6 = pnand %p2772_p5, %p2769_p4 }
  0x79   :  { %2777 = shalt.err (!%p2774_p6)
}
  0x7a   :  { %s2778_s29 = scalar_lea.vmem %s152_s26, 16  ;;  %s2782_s1 = scalar_lea.vmem %s152_s26, 32 }
  0x7b   :  { %p2779_p7 = scmp.ne.s32.totalorder %s152_s26, %s2778_s29  ;;  %p2783_p8 = scmp.lt.s32.totalorder %s152_s26, %s152_s26 }
  0x7c   :  { %p2784_p9 = scmp.lt.s32.totalorder %s2782_s1, %s2778_s29 }
  0x7e   :  { %p2785_p10 = por %p2784_p9, %p2783_p8 }
  0x80   :  { %p2786_p11 = pnand %p2785_p10, %p2779_p7 }
  0x82   :  { %2789 = shalt.err (!%p2786_p11)
}
  0x83   :  { %154 = dma.hbm_to_vmem [thread:$0]  %s3818_s13, 16, %s152_s26, [#allocation18]  }
  0x84   :  { %s3081_s4 = smov [#allocation20]   ;;  %s3082_s30 = smov [#allocation23]  }
  0x85   :  { %s175_s5 = sshll.u32 %s3081_s4, 4  ;;  %s197_s8 = sshll.u32 %s3082_s30, 4  ;;  %s176_s5 = int_to_ptr.vmem [resolvable:$true] %s175_s5  ;;  %s198_s8 = int_to_ptr.vmem [resolvable:$true] %s197_s8 }
  0x86   :  { %s2790_s3 = scalar_lea.hbm %s3822_s17, 16 }
  0x87   :  { %p2791_p12 = scmp.ne.s32.totalorder %s3822_s17, %s2790_s3  ;;  %p2794_p13 = scmp.lt.u32.totalorder %s2790_s3, %s3822_s17 }
  0x89   :  { %p2796_p0 = pnand %p2794_p13, %p2791_p12 }
  0x8b   :  { %2799 = shalt.err (!%p2796_p0)
}
  0x8c   :  { %s2800_s13 = scalar_lea.vmem %s176_s5, 16  ;;  %s2804_s26 = scalar_lea.vmem %s176_s5, 32 }
  0x8d   :  { %p2801_p1 = scmp.ne.s32.totalorder %s176_s5, %s2800_s13  ;;  %p2805_p2 = scmp.lt.s32.totalorder %s176_s5, %s176_s5 }
  0x8e   :  { %p2806_p3 = scmp.lt.s32.totalorder %s2804_s26, %s2800_s13 }
  0x90   :  { %p2807_p4 = por %p2806_p3, %p2805_p2 }
  0x92   :  { %p2808_p5 = pnand %p2807_p4, %p2801_p1 }
  0x94   :  { %2811 = shalt.err (!%p2808_p5)
}
  0x95   :  { %178 = dma.hbm_to_vmem [thread:$0]  %s3822_s17, 16, %s176_s5, [#allocation21]  }
  0x96   :  { %s2812_s4 = scalar_lea.hbm %s3825_s20, 16 }
  0x97   :  { %p2813_p6 = scmp.ne.s32.totalorder %s3825_s20, %s2812_s4  ;;  %p2816_p7 = scmp.lt.u32.totalorder %s2812_s4, %s3825_s20 }
  0x99   :  { %p2818_p8 = pnand %p2816_p7, %p2813_p6 }
  0x9b   :  { %2821 = shalt.err (!%p2818_p8)
}
  0x9c   :  { %s2822_s7 = scalar_lea.vmem %s198_s8, 16  ;;  %s2826_s24 = scalar_lea.vmem %s198_s8, 32 }
  0x9d   :  { %p2823_p9 = scmp.ne.s32.totalorder %s198_s8, %s2822_s7  ;;  %p2827_p10 = scmp.lt.s32.totalorder %s198_s8, %s198_s8 }
  0x9e   :  { %p2828_p11 = scmp.lt.s32.totalorder %s2826_s24, %s2822_s7 }
  0xa0   :  { %p2829_p12 = por %p2828_p11, %p2827_p10 }
  0xa2   :  { %p2830_p13 = pnand %p2829_p12, %p2823_p9 }
  0xa4   :  { %2833 = shalt.err (!%p2830_p13)
}
  0xa5   :  { %200 = dma.hbm_to_vmem [thread:$0]  %s3825_s20, 16, %s198_s8, [#allocation24]  }
  0xa6   :  { %s3083_s28 = smov [#allocation2]   ;;  %s3084_s13 = smov [#allocation7]  }
  0xa7   :  { %s51_s0 = sshll.u32 %s3083_s28, 4  ;;  %s75_s26 = sshll.u32 %s3084_s13, 4  ;;  %s52_s0 = int_to_ptr.vmem [resolvable:$true] %s51_s0  ;;  %s76_s26 = int_to_ptr.vmem [resolvable:$true] %s75_s26 }
  0xa8   :  { %s3865_s2 = sld [smem:[#allocation40_spill]] }
  0xae   :  { %s2834_s27 = scalar_lea.hbm %s3865_s2, 128 }
  0xaf   :  { %p2835_p0 = scmp.ne.s32.totalorder %s3865_s2, %s2834_s27  ;;  %p2838_p1 = scmp.lt.u32.totalorder %s2834_s27, %s3865_s2 }
  0xb1   :  { %p2840_p2 = pnand %p2838_p1, %p2835_p0 }
  0xb3   :  { %2843 = shalt.err (!%p2840_p2)
}
  0xb4   :  { %s2844_s20 = scalar_lea.vmem %s52_s0, 128  ;;  %p2849_p4 = scmp.lt.s32.totalorder %s52_s0, %s52_s0 }
  0xb5   :  { %p2845_p3 = scmp.ne.s32.totalorder %s52_s0, %s2844_s20  ;;  %p2850_p5 = scmp.lt.s32.totalorder %s2844_s20, %s2844_s20 }
  0xb7   :  { %p2851_p6 = por %p2850_p5, %p2849_p4 }
  0xb9   :  { %p2852_p7 = pnand %p2851_p6, %p2845_p3 }
  0xbb   :  { %2855 = shalt.err (!%p2852_p7)
}
  0xbc   :  { %54 = dma.hbm_to_vmem [thread:$0]  %s3865_s2, 128, %s52_s0, [#allocation3]  }
  0xbd   :  { %s3866_s17 = sld [smem:[#allocation43_spill]] }
  0xc3   :  { %s2856_s5 = scalar_lea.hbm %s3866_s17, 32 }
  0xc4   :  { %p2857_p8 = scmp.ne.s32.totalorder %s3866_s17, %s2856_s5  ;;  %p2860_p9 = scmp.lt.u32.totalorder %s2856_s5, %s3866_s17 }
  0xc6   :  { %p2862_p10 = pnand %p2860_p9, %p2857_p8 }
  0xc8   :  { %2865 = shalt.err (!%p2862_p10)
}
  0xc9   :  { %s2866_s27 = scalar_lea.vmem %s76_s26, 32  ;;  %p2871_p12 = scmp.lt.s32.totalorder %s76_s26, %s76_s26 }
  0xca   :  { %p2867_p11 = scmp.ne.s32.totalorder %s76_s26, %s2866_s27  ;;  %p2872_p13 = scmp.lt.s32.totalorder %s2866_s27, %s2866_s27 }
  0xcc   :  { %p2873_p0 = por %p2872_p13, %p2871_p12 }
  0xce   :  { %p2874_p1 = pnand %p2873_p0, %p2867_p11 }
  0xd0   :  { %2877 = shalt.err (!%p2874_p1)
}
  0xd1   :  { %78 = dma.hbm_to_vmem [thread:$0]  %s3866_s17, 32, %s76_s26, [#allocation6]  }
  0xd2   :  { %s3085_s4 = smov [#allocation10]   ;;  %s3086_s10 = smov [#allocation13]  }
  0xd3   :  { %s95_s30 = sshll.u32 %s3085_s4, 4  ;;  %s117_s9 = sshll.u32 %s3086_s10, 4  ;;  %s96_s30 = int_to_ptr.vmem [resolvable:$true] %s95_s30  ;;  %s118_s9 = int_to_ptr.vmem [resolvable:$true] %s117_s9 }
  0xd4   :  { %s3867_s3 = sld [smem:[#allocation45_spill]] }
  0xda   :  { %s2878_s7 = scalar_lea.hbm %s3867_s3, 128 }
  0xdb   :  { %p2879_p2 = scmp.ne.s32.totalorder %s3867_s3, %s2878_s7  ;;  %p2882_p3 = scmp.lt.u32.totalorder %s2878_s7, %s3867_s3 }
  0xdd   :  { %p2884_p4 = pnand %p2882_p3, %p2879_p2 }
  0xdf   :  { %2887 = shalt.err (!%p2884_p4)
}
  0xe0   :  { %s2888_s26 = scalar_lea.vmem %s96_s30, 128  ;;  %p2893_p6 = scmp.lt.s32.totalorder %s96_s30, %s96_s30 }
  0xe1   :  { %p2889_p5 = scmp.ne.s32.totalorder %s96_s30, %s2888_s26  ;;  %p2894_p7 = scmp.lt.s32.totalorder %s2888_s26, %s2888_s26 }
  0xe3   :  { %p2895_p8 = por %p2894_p7, %p2893_p6 }
  0xe5   :  { %p2896_p9 = pnand %p2895_p8, %p2889_p5 }
  0xe7   :  { %2899 = shalt.err (!%p2896_p9)
}
  0xe8   :  { %98 = dma.hbm_to_vmem [thread:$0]  %s3867_s3, 128, %s96_s30, [#allocation9]  }
  0xe9   :  { %s3868_s0 = sld [smem:[#allocation48_spill]] }
  0xef   :  { %s2900_s2 = scalar_lea.hbm %s3868_s0, 16 }
  0xf0   :  { %p2901_p10 = scmp.ne.s32.totalorder %s3868_s0, %s2900_s2  ;;  %p2904_p11 = scmp.lt.u32.totalorder %s2900_s2, %s3868_s0 }
  0xf2   :  { %p2906_p12 = pnand %p2904_p11, %p2901_p10 }
  0xf4   :  { %2909 = shalt.err (!%p2906_p12)
}
  0xf5   :  { %s2910_s7 = scalar_lea.vmem %s118_s9, 16  ;;  %s2914_s24 = scalar_lea.vmem %s118_s9, 32 }
  0xf6   :  { %p2911_p13 = scmp.ne.s32.totalorder %s118_s9, %s2910_s7  ;;  %p2915_p0 = scmp.lt.s32.totalorder %s118_s9, %s118_s9 }
  0xf7   :  { %p2916_p1 = scmp.lt.s32.totalorder %s2914_s24, %s2910_s7 }
  0xf9   :  { %p2917_p2 = por %p2916_p1, %p2915_p0 }
  0xfb   :  { %p2918_p3 = pnand %p2917_p2, %p2911_p13 }
  0xfd   :  { %2921 = shalt.err (!%p2918_p3)
}
  0xfe   :  { %120 = dma.hbm_to_vmem [thread:$0]  %s3868_s0, 16, %s118_s9, [#allocation12]  }
  0xff   :  { %s3087_s5 = smov [#allocation16]   ;;  %s3088_s13 = smov [#allocation19]  }
 0x100   :  { %s141_s28 = sshll.u32 %s3087_s5, 4  ;;  %s165_s26 = sshll.u32 %s3088_s13, 4  ;;  %s142_s28 = int_to_ptr.vmem [resolvable:$true] %s141_s28  ;;  %s166_s26 = int_to_ptr.vmem [resolvable:$true] %s165_s26 }
 0x101   :  { %s2922_s1 = scalar_lea.hbm %s3817_s12, 16 }
 0x102   :  { %p2923_p4 = scmp.ne.s32.totalorder %s3817_s12, %s2922_s1  ;;  %p2926_p5 = scmp.lt.u32.totalorder %s2922_s1, %s3817_s12 }
 0x104   :  { %p2928_p6 = pnand %p2926_p5, %p2923_p4 }
 0x106   :  { %2931 = shalt.err (!%p2928_p6)
}
 0x107   :  { %s2932_s9 = scalar_lea.vmem %s142_s28, 16  ;;  %s2936_s0 = scalar_lea.vmem %s142_s28, 32 }
 0x108   :  { %p2933_p7 = scmp.ne.s32.totalorder %s142_s28, %s2932_s9  ;;  %p2937_p8 = scmp.lt.s32.totalorder %s142_s28, %s142_s28 }
 0x109   :  { %p2938_p9 = scmp.lt.s32.totalorder %s2936_s0, %s2932_s9 }
 0x10b   :  { %p2939_p10 = por %p2938_p9, %p2937_p8 }
 0x10d   :  { %p2940_p11 = pnand %p2939_p10, %p2933_p7 }
 0x10f   :  { %2943 = shalt.err (!%p2940_p11)
}
 0x110   :  { %144 = dma.hbm_to_vmem [thread:$0]  %s3817_s12, 16, %s142_s28, [#allocation15]  }
 0x111   :  { %s2944_s30 = scalar_lea.hbm %s3821_s16, 16 }
 0x112   :  { %p2945_p12 = scmp.ne.s32.totalorder %s3821_s16, %s2944_s30  ;;  %p2948_p13 = scmp.lt.u32.totalorder %s2944_s30, %s3821_s16 }
 0x114   :  { %p2950_p0 = pnand %p2948_p13, %p2945_p12 }
 0x116   :  { %2953 = shalt.err (!%p2950_p0)
}
 0x117   :  { %s2954_s29 = scalar_lea.vmem %s166_s26, 16  ;;  %s2958_s1 = scalar_lea.vmem %s166_s26, 32 }
 0x118   :  { %p2955_p1 = scmp.ne.s32.totalorder %s166_s26, %s2954_s29  ;;  %p2959_p2 = scmp.lt.s32.totalorder %s166_s26, %s166_s26 }
 0x119   :  { %p2960_p3 = scmp.lt.s32.totalorder %s2958_s1, %s2954_s29 }
 0x11b   :  { %p2961_p4 = por %p2960_p3, %p2959_p2 }
 0x11d   :  { %p2962_p5 = pnand %p2961_p4, %p2955_p1 }
 0x11f   :  { %2965 = shalt.err (!%p2962_p5)
}
 0x120   :  { %168 = dma.hbm_to_vmem [thread:$0]  %s3821_s16, 16, %s166_s26, [#allocation18]  }
 0x121   :  { %s3089_s27 = smov [#allocation22]   ;;  %s3090_s4 = smov [#allocation25]  }
 0x122   :  { %s185_s2 = sshll.u32 %s3089_s27, 4  ;;  %s207_s10 = sshll.u32 %s3090_s4, 4  ;;  %s186_s2 = int_to_ptr.vmem [resolvable:$true] %s185_s2  ;;  %s208_s10 = int_to_ptr.vmem [resolvable:$true] %s207_s10 }
 0x123   :  { %s2966_s20 = scalar_lea.hbm %s3823_s18, 16 }
 0x124   :  { %p2967_p6 = scmp.ne.s32.totalorder %s3823_s18, %s2966_s20  ;;  %p2970_p7 = scmp.lt.u32.totalorder %s2966_s20, %s3823_s18 }
 0x126   :  { %p2972_p8 = pnand %p2970_p7, %p2967_p6 }
 0x128   :  { %2975 = shalt.err (!%p2972_p8)
}
 0x129   :  { %s2976_s16 = scalar_lea.vmem %s186_s2, 16  ;;  %s2980_s26 = scalar_lea.vmem %s186_s2, 32 }
 0x12a   :  { %p2977_p9 = scmp.ne.s32.totalorder %s186_s2, %s2976_s16  ;;  %p2981_p10 = scmp.lt.s32.totalorder %s186_s2, %s186_s2 }
 0x12b   :  { %p2982_p11 = scmp.lt.s32.totalorder %s2980_s26, %s2976_s16 }
 0x12d   :  { %p2983_p12 = por %p2982_p11, %p2981_p10 }
 0x12f   :  { %p2984_p13 = pnand %p2983_p12, %p2977_p9 }
 0x131   :  { %2987 = shalt.err (!%p2984_p13)
}
 0x132   :  { %188 = dma.hbm_to_vmem [thread:$0]  %s3823_s18, 16, %s186_s2, [#allocation21]  }
 0x133   :  { %s2988_s29 = scalar_lea.hbm %s3826_s21, 16 }
 0x134   :  { %p2989_p0 = scmp.ne.s32.totalorder %s3826_s21, %s2988_s29  ;;  %p2992_p1 = scmp.lt.u32.totalorder %s2988_s29, %s3826_s21 }
 0x136   :  { %p2994_p2 = pnand %p2992_p1, %p2989_p0 }
 0x138   :  { %2997 = shalt.err (!%p2994_p2)
}
 0x139   :  { %s2998_s4 = scalar_lea.vmem %s208_s10, 16  ;;  %s3002_s9 = scalar_lea.vmem %s208_s10, 32 }
 0x13a   :  { %p2999_p3 = scmp.ne.s32.totalorder %s208_s10, %s2998_s4  ;;  %p3003_p4 = scmp.lt.s32.totalorder %s208_s10, %s208_s10 }
 0x13b   :  { %p3004_p5 = scmp.lt.s32.totalorder %s3002_s9, %s2998_s4 }
 0x13d   :  { %p3005_p6 = por %p3004_p5, %p3003_p4 }
 0x13f   :  { %p3006_p7 = pnand %p3005_p6, %p2999_p3 }
 0x141   :  { %3009 = shalt.err (!%p3006_p7)
}
 0x142   :  { %210 = dma.hbm_to_vmem [thread:$0]  %s3826_s21, 16, %s208_s10, [#allocation24]  }
 0x143   :  { %s3091_s0 = smov [#allocation26]   ;;  %s3010_s24 = scalar_lea.hbm %s3827_s22, 512 }
 0x144   :  { %s216_s20 = sshll.u32 %s3091_s0, 4  ;;  %p3011_p8 = scmp.ne.s32.totalorder %s3827_s22, %s3010_s24  ;;  %s217_s20 = int_to_ptr.vmem [resolvable:$true] %s216_s20 }
 0x145   :  { %p3014_p9 = scmp.lt.u32.totalorder %s3010_s24, %s3827_s22 }
 0x147   :  { %p3016_p10 = pnand %p3014_p9, %p3011_p8 }
 0x149   :  { %3019 = shalt.err (!%p3016_p10)
}
 0x14a   :  { %s3020_s5 = scalar_lea.vmem %s217_s20, 512  ;;  %p3025_p12 = scmp.lt.s32.totalorder %s217_s20, %s217_s20 }
 0x14b   :  { %p3021_p11 = scmp.ne.s32.totalorder %s217_s20, %s3020_s5  ;;  %p3026_p13 = scmp.lt.s32.totalorder %s3020_s5, %s3020_s5 }
 0x14d   :  { %p3027_p0 = por %p3026_p13, %p3025_p12 }
 0x14f   :  { %p3028_p1 = pnand %p3027_p0, %p3021_p11 }
 0x151   :  { %3031 = shalt.err (!%p3028_p1)
}
 0x152   :  { %222 = dma.hbm_to_vmem [thread:$0]  %s3827_s22, 512, %s217_s20, [#allocation27], %s3075_s6, %s3075_s6, %s3076_s11  }
 0x153   :  { %3054 = dma.done.wait [#allocation3], 128  }
 0x154   :  { %3055 = vsyncadd [#allocation3], 4294967168 }
 0x155   :  { %3056 = dma.done.wait [#allocation6], 288  }
 0x156   :  { %3057 = vsyncadd [#allocation6], 4294967008 }
 0x157   :  { %3058 = dma.done.wait [#allocation9], 144  }
 0x158   :  { %3059 = vsyncadd [#allocation9], 4294967152 }
 0x159   :  { %3060 = dma.done.wait [#allocation12], 32  }
 0x15a   :  { %3061 = vsyncadd [#allocation12], 4294967264 }
 0x15b   :  { %3062 = dma.done.wait [#allocation15], 272  }
 0x15c   :  { %3063 = vsyncadd [#allocation15], 4294967024 }
 0x15d   :  { %3064 = dma.done.wait [#allocation18], 32  }
 0x15e   :  { %3065 = vsyncadd [#allocation18], 4294967264 }
 0x15f   :  { %3066 = dma.done.wait [#allocation21], 32  }
 0x160   :  { %3067 = vsyncadd [#allocation21], 4294967264 }
 0x161   :  { %3068 = dma.done.wait [#allocation24], 32  }
 0x162   :  { %3069 = vsyncadd [#allocation24], 4294967264 }
 0x163   :  { %3070 = dma.done.wait [#allocation27], 512  }
 0x164   :  { %3071 = vsyncadd [#allocation27], 4294966784  ;;  %v3092_v0 = vmov 0.0   ;;  %vm3093_vm0 = vmmov 0   ;;  %v3094_v1 = vmov 0   ;;  %vm392_vm1 = vcmask 1044480  }
 0x165   :  { %2291 = vmatprep.subr.mxu0 %v3092_v0  ;;  %2293 = vmatprep.mubr.msk.f32.mxu0 %vm3093_vm0, %v3092_v0  ;;  %vm388_vm2 = vcmask 39936   ;;  %v380_v2 = vld [vmem:[#allocation10] sm:$0x1f]  ;;  %s3869_s17 = sld [smem:[#allocation39_spill]]  ;;  %v3095_v6 = vmov 1   ;;  %v285_v8 = vld [vmem:[#allocation14] sm:$0xff]  ;;  %v338_v12 = vlaneseq }
 0x166   :  { %2614 = vset.pattern.permute.xlu0 %v3094_v1  ;;  %2616 = vset.pattern.permute.xlu1 %v3094_v1  ;;  %v379_v3 = vld [vmem:[#allocation2] sm:$0xff]  ;;  %v286_v9 = vld [vmem:[#allocation14 + $0x8] sm:$0xff]  ;;  %v3096_v11 = vmov 0.0|0.0   ;;  %v277_v15 = vld [vmem:[#allocation7] sm:$0x3]  ;;  %s3870_s9 = sld [smem:[#allocation50_spill]] }
 0x167   :  { %2325 = vmatprep.mubr.msk.f32.mxu1 %vm3093_vm0, %v3092_v0  ;;  %2292 = vmatpush3.msk.msra.mxu0 %vm392_vm1, %v380_v2  ;;  %v2485_v10 = vpack.c.bf16 %v286_v9, %v285_v8  ;;  %v3458_v13 = vshrl.u32 %v338_v12, 7  ;;  %v2154_v26 = vld [vmem:[#allocation8] ss:$0 sm:$0xff]  ;;  %vm473_vm3 = vcmask 130048   ;;  %v2155_v47 = vld [vmem:[#allocation11] ss:$0 sm:$0xff] }
 0x168   :  { %2294 = vmatmul.mubr.msk.f32.vlgmr.msra.gmra.mrb[0].mxu0 %vm388_vm2, %v379_v3  ;;  %2495 = vmatprep.subr.bf16.mxu1 %v3096_v11  ;;  %v571_v52 = vld [vmem:[#allocation5] sm:$0xff]  ;;  %vm580_vm4 = vcmask 261120   ;;  %v3499_v57 = vld [vmem:[#allocation17] ss:$0 sm:$0xff]  ;;  %s3097_s24 = smov 64   ;;  %s3098_s30 = smov 32  }
 0x169   :  { %2486 = vmatprep.subr.bf16.mxu0 %v2485_v10  ;;  %v340_v14 = vsub.s32 0, %v3458_v13  ;;  %v359_v16 = vsub.s32 1, %v3458_v13  ;;  %v3503_v61 = vld [vmem:[#allocation16] ss:$0 sm:$0xff]  ;;  %v297_v9 = vld [vmem:[%s3820_s15] sm:$0xff]  ;;  %v299_v12 = vld [vmem:[%s3820_s15 + $0x10] sm:$0xff] }
 0x16a   :  { %2488 = vmatpush3.bf16.msra.mxu0 %v2485_v10  ;;  %v298_v10 = vld [vmem:[%s3820_s15 + $0x8] sm:$0xff]  ;;  %s3871_s2 = sld [smem:[#allocation41_spill]]  ;;  %s3872_s27 = sld [smem:[#allocation51_spill]] }
 0x16b   :  { %v320_v4 = vld [vmem:[%s3869_s17] sm:$0xff]  ;;  %v321_v5 = vld [vmem:[%s3869_s17 + $0x8] sm:$0xff]  ;;  %v322_v7 = vld [vmem:[%s3869_s17 + $0x10] sm:$0xff]  ;;  %2489 = vmatprep.subr.bf16.mxu0 %v3096_v11  ;;  %v341_v18 = vrot.slane %v277_v15, %v340_v14  ;;  %v360_v20 = vrot.slane %v277_v15, %v359_v16  ;;  %v3517_v15 = vpack.c.bf16 %v298_v10, %v297_v9  ;;  %s3100_s8 = smov [#allocation28]  }
 0x16c   :  { %325 = vperm.xlu0 %2614, %v320_v4   ;;  %330 = vperm.xlu1 %2616, %v321_v5   ;;  %v287_v31 = vld [vmem:[%s3870_s9] sm:$0xff]  ;;  %v288_v32 = vld [vmem:[%s3870_s9 + $0x8] sm:$0xff]  ;;  %v289_v41 = vld [vmem:[%s3870_s9 + $0x10] sm:$0xff]  ;;  %s2132_s7 = sshll.u32 %s3100_s8, 4  ;;  %s2133_s7 = int_to_ptr.vmem [resolvable:$true] %s2132_s7 }
 0x16d   :  { %v3470_v39 = vpack.c.bf16 %v288_v32, %v287_v31  ;;  %v290_v42 = vld [vmem:[%s3870_s9 + $0x18] sm:$0xff]  ;;  %s3873_s9 = sld [smem:[#allocation47_spill]]  ;;  %p3037_p3 = scmp.lt.s32.totalorder %s2133_s7, %s2133_s7 }
 0x16e   :  { %v3481_v45 = vpack.c.bf16 %v290_v42, %v289_v41  ;;  %v300_v16 = vld [vmem:[%s3820_s15 + $0x18] sm:$0xff] }
 0x16f   :  { %v3563_v32 = vld [vmem:[#allocation20] ss:$0 sm:$0xff] }
 0x170   :  { %2615 = vset.pattern.permute.xlu0 %v3095_v6  ;;  %2617 = vset.pattern.permute.xlu1 %v3095_v6 }
 0x171   :  { %346 = vperm.xlu0 %2615, %v320_v4   ;;  %350 = vperm.xlu1 %2617, %v321_v5  }
 0x175   :  { %354 = vperm.xlu0 %2615, %v322_v7   ;;  %2618 = vset.pattern.permute.xlu1 %v3094_v1 }
 0x176   :  { %335 = vperm.xlu1 %2618, %v322_v7  }
 0x179   :  { %2619 = vset.pattern.permute.xlu0 %v3094_v1 }
 0x1eb   :  { %v326_v17 = vpop.permute.xlu0 %325  ;;  %v331_v19 = vpop.permute.xlu1 %330 }
 0x1ec   :  { %v342_v21 = vmul.f32 %v341_v18, %v326_v17  ;;  %v343_v22 = vmul.f32 %v341_v18, %v331_v19  ;;  %v293_v17 = vld [vmem:[%s3819_s14] sm:$0xff]  ;;  %v295_v19 = vld [vmem:[%s3819_s14 + $0x10] sm:$0xff] }
 0x1f0   :  { %v347_v23 = vpop.permute.xlu0 %346  ;;  %v351_v25 = vpop.permute.xlu1 %350 }
 0x1f1   :  { %v361_v24 = vmul.f32 %v360_v20, %v347_v23  ;;  %v362_v27 = vmul.f32 %v360_v20, %v351_v25 }
 0x1f3   :  { %v364_v28 = vadd.f32 %v361_v24, %v342_v21  ;;  %v365_v29 = vadd.f32 %v362_v27, %v343_v22  ;;  %v3535_v21 = vpack.c.bf16 %v300_v16, %v299_v12  ;;  %v3545_v24 = vld [vmem:[#allocation5 + $0x8] sm:$0xff] }
 0x1f4   :  { %v355_v30 = vpop.permute.xlu0 %354 }
 0x1f5   :  { %v373_v33 = vadd.f32 %v2154_v26, %v364_v28  ;;  %v363_v34 = vmul.f32 %v360_v20, %v355_v30  ;;  %v374_v35 = vadd.f32 %v2154_v26, %v365_v29  ;;  %v336_v36 = vpop.permute.xlu1 %335  ;;  %v296_v20 = vld [vmem:[%s3819_s14 + $0x18] sm:$0xff] }
 0x1f6   :  { %v344_v38 = vmul.f32 %v341_v18, %v336_v36  ;;  %v294_v18 = vld [vmem:[%s3819_s14 + $0x8] sm:$0xff]  ;;  %v3541_v23 = vpack.c.bf16 %v296_v20, %v295_v19  ;;  %s3099_s14 = smov 96  }
 0x1f7   :  { %v376_v37 = vmax.f32 %v373_v33, 0.0  ;;  %v377_v40 = vmax.f32 %v374_v35, 0.0  ;;  %v3537_v22 = vpack.c.bf16 %v294_v18, %v293_v17 }
 0x1f8   :  { %v366_v43 = vadd.f32 %v363_v34, %v344_v38 }
 0x1f9   :  { %2300 = vmatprep.mubr.msk.f32.mxu0 %vm473_vm3, %v376_v37  ;;  %2497 = vmatpush3.bf16.msra.mxu1 %v3537_v22  ;;  %v3581_v37 = vld [vmem:[#allocation19] ss:$0 sm:$0xff] }
 0x1fa   :  { %2301 = vmatmul.mubr.msk.f32.vlgmr.msra.gmra.mrb[2].mxu0 %vm473_vm3, %v377_v40  ;;  %v375_v44 = vadd.f32 %v2154_v26, %v366_v43  ;;  %2498 = vmatprep.subr.bf16.mxu1 %v3096_v11 }
 0x1fb   :  { %2491 = vmatpush3.bf16.msra.mxu0 %v3470_v39 }
 0x1fc   :  { %2492 = vmatprep.subr.bf16.mxu0 %v3096_v11  ;;  %v378_v46 = vmax.f32 %v375_v44, 0.0 }
 0x1fd   :  { %2500 = vmatpush3.bf16.msra.mxu1 %v3541_v23 }
 0x1fe   :  { %2303 = vmatprep.mubr.msk.f32.mxu0 %vm473_vm3, %v378_v46  ;;  %2507 = vmatprep.subr.bf16.mxu1 %v3096_v11 }
 0x1ff   :  { %2494 = vmatpush3.bf16.msra.mxu0 %v3481_v45 }
 0x200   :  { %2501 = vmatprep.subr.bf16.mxu0 %v3096_v11 }
 0x23b   :  { %v462_v48 = vpop.f32.mrb[0].mxu0 }
 0x23c   :  { %v463_v49 = vadd.f32 %v2155_v47, %v462_v48  ;;  %v2295_v50 = vpop.f32.mrb[1].mxu0 }
 0x23e   :  { %v466_v51 = vmax.f32 %v463_v49, 0.0 }
 0x240   :  { %2304 = vmatmul.mubr.msk.f32.gmra.mrb[4].mxu0 %vm473_vm3, %v466_v51 }
 0x241   :  { %2314 = vmatprep.mubr.msk.f32.mxu0 %vm3093_vm0, %v3092_v0 }
 0x244   :  { %2315 = vmatmul.mubr.msk.f32.vlgmr.msra.gmra.mrb[6].mxu0 %vm580_vm4, %v571_v52 }
 0x245   :  { %2336 = vmatprep.mubr.msk.f32.mxu0 %vm3093_vm0, %v3092_v0  ;;  %2503 = vmatpush3.bf16.msra.mxu0 %v3517_v15 }
 0x246   :  { %2504 = vmatprep.subr.bf16.mxu0 %v3096_v11 }
 0x249   :  { %2506 = vmatpush3.bf16.msra.mxu0 %v3535_v21 }
 0x24a   :  { %2513 = vmatprep.subr.bf16.mxu0 %v3096_v11 }
 0x24c   :  { %2337 = vmatmul.mubr.msk.f32.vlgmr.msra.gmra.mrb[8].mxu0 %vm580_vm4, %v3545_v24 }
 0x24d   :  { %2515 = vmatpush3.bf16.msra.mxu0 %v3537_v22  ;;  %2358 = vmatprep.mubr.msk.f32.mxu0 %vm3093_vm0, %v3092_v0 }
 0x24e   :  { %2516 = vmatprep.subr.bf16.mxu0 %v3096_v11 }
 0x251   :  { %2518 = vmatpush3.bf16.msra.mxu0 %v3541_v23 }
 0x252   :  { %2525 = vmatprep.subr.bf16.mxu0 %v3096_v11 }
 0x2cd   :  { %v3493_v53 = vpop.f32.mrb[2].mxu0 }
 0x2ce   :  { %v552_v54 = vpop.f32.mrb[3].mxu0 }
 0x2cf   :  { %v553_v62 = vadd.f32 %v3503_v61, %v552_v54  ;;  %v558_v54 = vadd.f32 %v3493_v53, %v3503_v61 }
 0x313   :  { %v3495_v55 = vpop.f32.mrb[4].mxu0 }
 0x314   :  { %v3497_v56 = vpop.f32.mrb[5].mxu0 }
 0x317   :  { %v650_v58 = vpop.f32.mrb[6].mxu0 }
 0x318   :  { %v651_v59 = vadd.f32 %v3499_v57, %v650_v58  ;;  %v2316_v60 = vpop.f32.mrb[7].mxu0 }
 0x31a   :  { %662 = vrot.lane.b32.xlu1 %v651_v59, %s3097_s24  ;;  %v654_v63 = vadd.f32 %v651_v59, %v553_v62 }
 0x31c   :  { %v2165_v1 = vmul.f32 -1.442695, %v654_v63 }
 0x31e   :  { %2620 = vpow2.f32 %v2165_v1 }
 0x31f   :  { %v839_v33 = vpop.f32.mrb[8].mxu0 }
 0x320   :  { %v840_v34 = vadd.f32 %v3563_v32, %v839_v33  ;;  %v2338_v35 = vpop.f32.mrb[9].mxu0 }
 0x328   :  { %v2621_v2 = vpop.eup %2620 }
 0x329   :  { %v658_v3 = vadd.f32 1.0, %v2621_v2 }
 0x32b   :  { %2622 = vrcp.f32 %v658_v3 }
 0x335   :  { %v2623_v4 = vpop.eup %2622 }
 0x336   :  { %v672_v27 = vsub.f32 1.0, %v2623_v4 }
 0x38c   :  { %v663_v5 = vpop.permute.xlu1 %662 }
 0x38d   :  { %v665_v6 = vmul.f32 %v2623_v4, %v663_v5 }
 0x38f   :  { %667 = vrot.lane.b32.xlu0 %v665_v6, %s3097_s24 }
 0x393   :  { %678 = vrot.lane.b32.xlu0 %v571_v52, %s3098_s30 }
 0x397   :  { %851 = vrot.lane.b32.xlu0 %v840_v34, %s3097_s24 }
 0x401   :  { %v668_v7 = vpop.permute.xlu0 %667 }
 0x402   :  { %v670_v8 = vadd.f32 %v668_v7, %v553_v62 }
 0x404   :  { %2624 = vtanh.f32 %v670_v8 }
 0x405   :  { %v679_v26 = vpop.permute.xlu0 %678 }
 0x406   :  { %v681_v29 = vmul.f32 %v2623_v4, %v679_v26 }
 0x409   :  { %v852_v50 = vpop.permute.xlu0 %851 }
 0x40e   :  { %v2625_v25 = vpop.eup %2624 }
 0x40f   :  { %674 = vrot.lane.b32.xlu1 %v2625_v25, %s3099_s14 }
 0x481   :  { %v675_v28 = vpop.permute.xlu1 %674 }
 0x482   :  { %v677_v30 = vmul.f32 %v675_v28, %v672_v27 }
 0x484   :  { %v3559_v31 = vadd.f32 %v681_v29, %v677_v30 }
 0x486   :  { %690 = vrot.lane.b32.xlu1 %v3559_v31, %s3099_s14 }
 0x4f8   :  { %v691_v36 = vpop.permute.xlu1 %690 }
 0x4f9   :  { %2326 = vmatmul.mubr.msk.f32.vlgmr.msra.gmra.mrb[0].mxu1 %vm580_vm4, %v691_v36 }
 0x4fa   :  { %2509 = vmatpush3.bf16.msra.mxu1 %v3470_v39  ;;  %2347 = vmatprep.mubr.msk.f32.mxu1 %vm3093_vm0, %v3092_v0 }
 0x4fb   :  { %2510 = vmatprep.subr.bf16.mxu1 %v3096_v11 }
 0x4fe   :  { %2512 = vmatpush3.bf16.msra.mxu1 %v3481_v45 }
 0x4ff   :  { %2519 = vmatprep.subr.bf16.mxu1 %v3096_v11 }
 0x501   :  { %2348 = vmatmul.mubr.msk.f32.vlgmr.msra.gmra.mrb[2].mxu1 %vm580_vm4, %v691_v36 }
 0x502   :  { %2521 = vmatpush3.bf16.msra.mxu1 %v3517_v15  ;;  %2369 = vmatprep.mubr.msk.f32.mxu1 %vm3093_vm0, %v3092_v0 }
 0x503   :  { %2522 = vmatprep.subr.bf16.mxu1 %v3096_v11 }
 0x506   :  { %2524 = vmatpush3.bf16.msra.mxu1 %v3535_v21 }
 0x507   :  { %2531 = vmatprep.subr.bf16.mxu1 %v3096_v11 }
 0x5cc   :  { %v760_v38 = vpop.f32.mrb[0].mxu1 }
 0x5cd   :  { %v761_v40 = vadd.f32 %v3581_v37, %v760_v38  ;;  %v2327_v41 = vpop.f32.mrb[1].mxu1 }
 0x5cf   :  { %v843_v42 = vadd.f32 %v840_v34, %v761_v40 }
 0x5d1   :  { %v2170_v43 = vmul.f32 -1.442695, %v843_v42 }
 0x5d3   :  { %2626 = vpow2.f32 %v2170_v43 }
 0x5d4   :  { %v938_v44 = vpop.f32.mrb[2].mxu1 }
 0x5d5   :  { %v939_v46 = vadd.f32 %v3499_v57, %v938_v44  ;;  %v2349_v47 = vpop.f32.mrb[3].mxu1 }
 0x5d7   :  { %950 = vrot.lane.b32.xlu1 %v939_v46, %s3097_s24  ;;  %v942_v58 = vadd.f32 %v939_v46, %v558_v54 }
 0x5d9   :  { %v2172_v59 = vmul.f32 -1.442695, %v942_v58 }
 0x5dd   :  { %v2627_v48 = vpop.eup %2626 }
 0x5de   :  { %v847_v49 = vadd.f32 1.0, %v2627_v48  ;;  %v563_v48 = vadd.f32 %v3503_v61, %v3497_v56 }
 0x5e0   :  { %2628 = vrcp.f32 %v847_v49 }
 0x5e1   :  { %2630 = vpow2.f32 %v2172_v59 }
 0x5ea   :  { %v2629_v51 = vpop.eup %2628 }
 0x5eb   :  { %v854_v52 = vmul.f32 %v2629_v51, %v852_v50  ;;  %v2631_v60 = vpop.eup %2630  ;;  %v861_v9 = vsub.f32 1.0, %v2629_v51 }
 0x5ec   :  { %v946_v62 = vadd.f32 1.0, %v2631_v60 }
 0x5ed   :  { %856 = vrot.lane.b32.xlu0 %v854_v52, %s3097_s24 }
 0x5ee   :  { %2632 = vrcp.f32 %v946_v62 }
 0x5f8   :  { %v2633_v63 = vpop.eup %2632 }
 0x5f9   :  { %v960_v18 = vsub.f32 1.0, %v2633_v63  ;;  %v966_v20 = vmul.f32 %v2633_v63, %v3559_v31 }
 0x649   :  { %v951_v1 = vpop.permute.xlu1 %950 }
 0x64a   :  { %v953_v2 = vmul.f32 %v2633_v63, %v951_v1 }
 0x64c   :  { %955 = vrot.lane.b32.xlu1 %v953_v2, %s3097_s24 }
 0x650   :  { %867 = vrot.lane.b32.xlu1 %v3545_v24, %s3098_s30  ;;  %s3032_s30 = scalar_lea.vmem %s2133_s7, 256 }
 0x651   :  { %p3033_p2 = scmp.ne.s32.totalorder %s2133_s7, %s3032_s30  ;;  %p3038_p4 = scmp.lt.s32.totalorder %s3032_s30, %s3032_s30 }
 0x653   :  { %p3039_p5 = por %p3038_p4, %p3037_p3 }
 0x655   :  { %p3040_p6 = pnand %p3039_p5, %p3033_p2 }
 0x65f   :  { %v857_v3 = vpop.permute.xlu0 %856 }
 0x660   :  { %v859_v4 = vadd.f32 %v857_v3, %v761_v40 }
 0x662   :  { %2634 = vtanh.f32 %v859_v4 }
 0x66c   :  { %v2635_v5 = vpop.eup %2634 }
 0x66d   :  { %863 = vrot.lane.b32.xlu0 %v2635_v5, %s3099_s14 }
 0x6be   :  { %v956_v53 = vpop.permute.xlu1 %955 }
 0x6bf   :  { %v958_v6 = vadd.f32 %v956_v53, %v558_v54 }
 0x6c1   :  { %2636 = vtanh.f32 %v958_v6 }
 0x6c2   :  { %v868_v8 = vpop.permute.xlu1 %867 }
 0x6c3   :  { %v870_v12 = vmul.f32 %v2629_v51, %v868_v8 }
 0x6cb   :  { %v2637_v7 = vpop.eup %2636 }
 0x6cc   :  { %962 = vrot.lane.b32.xlu0 %v2637_v7, %s3099_s14 }
 0x6df   :  { %v864_v10 = vpop.permute.xlu0 %863 }
 0x6e0   :  { %v866_v16 = vmul.f32 %v864_v10, %v861_v9 }
 0x6e2   :  { %v3594_v17 = vadd.f32 %v870_v12, %v866_v16 }
 0x6e4   :  { %1044 = vrot.lane.b32.xlu1 %v3594_v17, %s3099_s14 }
 0x73e   :  { %v963_v19 = vpop.permute.xlu0 %962 }
 0x73f   :  { %v965_v24 = vmul.f32 %v963_v19, %v960_v18 }
 0x741   :  { %v3599_v25 = vadd.f32 %v966_v20, %v965_v24 }
 0x743   :  { %969 = vrot.lane.b32.xlu0 %v3599_v25, %s3099_s14 }
 0x756   :  { %v1045_v26 = vpop.permute.xlu1 %1044 }
 0x757   :  { %2370 = vmatmul.mubr.msk.f32.vlgmr.msra.gmra.mrb[4].mxu1 %vm580_vm4, %v1045_v26 }
 0x758   :  { %2533 = vmatpush3.bf16.msra.mxu1 %v3537_v22  ;;  %2391 = vmatprep.mubr.msk.f32.mxu1 %vm3093_vm0, %v3092_v0 }
 0x759   :  { %2534 = vmatprep.subr.bf16.mxu1 %v3096_v11 }
 0x75c   :  { %2536 = vmatpush3.bf16.msra.mxu1 %v3541_v23 }
 0x75d   :  { %2543 = vmatprep.subr.bf16.mxu1 %v3096_v11 }
 0x7b5   :  { %v970_v27 = vpop.permute.xlu0 %969 }
 0x7b6   :  { %2359 = vmatmul.mubr.msk.f32.vlgmr.msra.gmra.mrb[10].mxu0 %vm580_vm4, %v970_v27 }
 0x7b7   :  { %2527 = vmatpush3.bf16.msra.mxu0 %v3470_v39  ;;  %2380 = vmatprep.mubr.msk.f32.mxu0 %vm3093_vm0, %v3092_v0 }
 0x7b8   :  { %2528 = vmatprep.subr.bf16.mxu0 %v3096_v11 }
 0x7bb   :  { %2530 = vmatpush3.bf16.msra.mxu0 %v3481_v45 }
 0x7bc   :  { %2537 = vmatprep.subr.bf16.mxu0 %v3096_v11 }
 0x7be   :  { %2381 = vmatmul.mubr.msk.f32.vlgmr.msra.gmra.mrb[12].mxu0 %vm580_vm4, %v970_v27 }
 0x7bf   :  { %2539 = vmatpush3.bf16.msra.mxu0 %v3517_v15  ;;  %2402 = vmatprep.mubr.msk.f32.mxu0 %vm3093_vm0, %v3092_v0 }
 0x7c0   :  { %2540 = vmatprep.subr.bf16.mxu0 %v3096_v11 }
 0x7c3   :  { %2542 = vmatpush3.bf16.msra.mxu0 %v3535_v21 }
 0x7c4   :  { %2549 = vmatprep.subr.bf16.mxu0 %v3096_v11 }
 0x82a   :  { %v1114_v28 = vpop.f32.mrb[4].mxu1 }
 0x82b   :  { %v1115_v29 = vadd.f32 %v3563_v32, %v1114_v28  ;;  %v2371_v30 = vpop.f32.mrb[5].mxu1 }
 0x82d   :  { %1126 = vrot.lane.b32.xlu1 %v1115_v29, %s3097_s24 }
 0x889   :  { %v1039_v31 = vpop.f32.mrb[10].mxu0 }
 0x88a   :  { %v1040_v33 = vadd.f32 %v3581_v37, %v1039_v31  ;;  %v2360_v34 = vpop.f32.mrb[11].mxu0 }
 0x88c   :  { %v1118_v35 = vadd.f32 %v1115_v29, %v1040_v33 }
 0x88e   :  { %v2175_v36 = vmul.f32 -1.442695, %v1118_v35 }
 0x890   :  { %2638 = vpow2.f32 %v2175_v36 }
 0x891   :  { %v1210_v38 = vpop.f32.mrb[12].mxu0 }
 0x892   :  { %v1211_v40 = vadd.f32 %v3499_v57, %v1210_v38  ;;  %v2382_v41 = vpop.f32.mrb[13].mxu0 }
 0x894   :  { %1222 = vrot.lane.b32.xlu0 %v1211_v40, %s3097_s24  ;;  %v1214_v49 = vadd.f32 %v1211_v40, %v563_v48 }
 0x896   :  { %v2177_v50 = vmul.f32 -1.442695, %v1214_v49 }
 0x89a   :  { %v2639_v42 = vpop.eup %2638 }
 0x89b   :  { %v1122_v43 = vadd.f32 1.0, %v2639_v42 }
 0x89d   :  { %2640 = vrcp.f32 %v1122_v43 }
 0x89e   :  { %2642 = vpow2.f32 %v2177_v50 }
 0x89f   :  { %v1127_v46 = vpop.permute.xlu1 %1126 }
 0x8a7   :  { %v2641_v44 = vpop.eup %2640 }
 0x8a8   :  { %v1129_v47 = vmul.f32 %v2641_v44, %v1127_v46  ;;  %v2643_v51 = vpop.eup %2642  ;;  %v1136_v3 = vsub.f32 1.0, %v2641_v44  ;;  %v1142_v5 = vmul.f32 %v2641_v44, %v3594_v17 }
 0x8a9   :  { %v1218_v52 = vadd.f32 1.0, %v2643_v51 }
 0x8aa   :  { %1131 = vrot.lane.b32.xlu1 %v1129_v47, %s3097_s24 }
 0x8ab   :  { %2644 = vrcp.f32 %v1218_v52  ;;  %v1688_v52 = vld [vmem:[%s3871_s2] sm:$0xff] }
 0x8b5   :  { %v2645_v54 = vpop.eup %2644 }
 0x8b6   :  { %v1232_v7 = vsub.f32 1.0, %v2645_v54  ;;  %v1238_v9 = vmul.f32 %v2645_v54, %v3599_v25 }
 0x906   :  { %v1223_v58 = vpop.permute.xlu0 %1222 }
 0x907   :  { %v1225_v59 = vmul.f32 %v2645_v54, %v1223_v58 }
 0x909   :  { %1227 = vrot.lane.b32.xlu0 %v1225_v59, %s3097_s24 }
 0x91c   :  { %v1132_v60 = vpop.permute.xlu1 %1131 }
 0x91d   :  { %v1134_v62 = vadd.f32 %v1132_v60, %v1040_v33  ;;  %v568_v33 = vadd.f32 %v3495_v55, %v3503_v61 }
 0x91f   :  { %2646 = vtanh.f32 %v1134_v62 }
 0x929   :  { %v2647_v63 = vpop.eup %2646 }
 0x92a   :  { %1138 = vrot.lane.b32.xlu1 %v2647_v63, %s3099_s14 }
 0x97b   :  { %v1228_v1 = vpop.permute.xlu0 %1227 }
 0x97c   :  { %v1230_v2 = vadd.f32 %v1228_v1, %v563_v48  ;;  %v304_v1 = vld [vmem:[%s3824_s19] sm:$0xff] }
 0x97e   :  { %2648 = vtanh.f32 %v1230_v2  ;;  %v305_v2 = vld [vmem:[%s3824_s19 + $0x8] sm:$0xff] }
 0x988   :  { %v2649_v56 = vpop.eup %2648 }
 0x989   :  { %1234 = vrot.lane.b32.xlu0 %v2649_v56, %s3099_s14  ;;  %v2562_v56 = vpack.c.bf16 %v305_v2, %v304_v1 }
 0x99c   :  { %v1139_v4 = vpop.permute.xlu1 %1138 }
 0x99d   :  { %v1141_v53 = vmul.f32 %v1139_v4, %v1136_v3  ;;  %v306_v3 = vld [vmem:[%s3824_s19 + $0x10] sm:$0xff]  ;;  %v307_v4 = vld [vmem:[%s3824_s19 + $0x18] sm:$0xff] }
 0x99f   :  { %v3636_v6 = vadd.f32 %v1142_v5, %v1141_v53  ;;  %v2565_v53 = vpack.c.bf16 %v307_v4, %v306_v3 }
 0x9a1   :  { %1316 = vrot.lane.b32.xlu1 %v3636_v6, %s3099_s14 }
 0x9fb   :  { %v1235_v8 = vpop.permute.xlu0 %1234 }
 0x9fc   :  { %v1237_v10 = vmul.f32 %v1235_v8, %v1232_v7 }
 0x9fe   :  { %v3641_v12 = vadd.f32 %v1238_v9, %v1237_v10 }
 0xa00   :  { %1241 = vrot.lane.b32.xlu0 %v3641_v12, %s3099_s14 }
 0xa13   :  { %v1317_v16 = vpop.permute.xlu1 %1316 }
 0xa14   :  { %2403 = vmatmul.mubr.msk.f32.vlgmr.msra.gmra.mrb[14].mxu0 %vm580_vm4, %v1317_v16 }
 0xa15   :  { %2551 = vmatpush3.bf16.msra.mxu0 %v3537_v22  ;;  %2424 = vmatprep.mubr.msk.f32.mxu0 %vm3093_vm0, %v3092_v0 }
 0xa16   :  { %2552 = vmatprep.subr.bf16.mxu0 %v3096_v11 }
 0xa19   :  { %2554 = vmatpush3.bf16.msra.mxu0 %v3541_v23 }
 0xa1a   :  { %2561 = vmatprep.subr.bf16.mxu0 %v3096_v11 }
 0xa72   :  { %v1242_v18 = vpop.permute.xlu0 %1241 }
 0xa73   :  { %2392 = vmatmul.mubr.msk.f32.vlgmr.msra.gmra.mrb[6].mxu1 %vm580_vm4, %v1242_v18 }
 0xa74   :  { %2545 = vmatpush3.bf16.msra.mxu1 %v3470_v39  ;;  %2413 = vmatprep.mubr.msk.f32.mxu1 %vm3093_vm0, %v3092_v0 }
 0xa75   :  { %2546 = vmatprep.subr.bf16.mxu1 %v3096_v11 }
 0xa78   :  { %2548 = vmatpush3.bf16.msra.mxu1 %v3481_v45 }
 0xa79   :  { %2555 = vmatprep.subr.bf16.mxu1 %v3096_v11 }
 0xa7b   :  { %2414 = vmatmul.mubr.msk.f32.vlgmr.msra.gmra.mrb[8].mxu1 %vm580_vm4, %v1242_v18 }
 0xa7c   :  { %2557 = vmatpush3.bf16.msra.mxu1 %v3517_v15  ;;  %2435 = vmatprep.mubr.msk.f32.mxu1 %vm3093_vm0, %v3092_v0 }
 0xa7d   :  { %2558 = vmatprep.subr.bf16.mxu1 %v3096_v11 }
 0xa80   :  { %2560 = vmatpush3.bf16.msra.mxu1 %v3535_v21 }
 0xa81   :  { %2567 = vmatprep.subr.bf16.mxu1 %v3096_v11 }
 0xae7   :  { %v1386_v39 = vpop.f32.mrb[14].mxu0 }
 0xae8   :  { %v1387_v22 = vadd.f32 %v3563_v32, %v1386_v39  ;;  %v2404_v23 = vpop.f32.mrb[15].mxu0 }
 0xaea   :  { %1398 = vrot.lane.b32.xlu1 %v1387_v22, %s3097_s24 }
 0xb46   :  { %v1311_v45 = vpop.f32.mrb[6].mxu1 }
 0xb47   :  { %v1312_v19 = vadd.f32 %v3581_v37, %v1311_v45  ;;  %v2393_v20 = vpop.f32.mrb[7].mxu1 }
 0xb49   :  { %v1390_v15 = vadd.f32 %v1387_v22, %v1312_v19  ;;  %v2188_v22 = vld [vmem:[#allocation25] ss:$0 sm:$0xff] }
 0xb4b   :  { %v2180_v24 = vmul.f32 -1.442695, %v1390_v15 }
 0xb4d   :  { %2650 = vpow2.f32 %v2180_v24 }
 0xb4e   :  { %v1482_v25 = vpop.f32.mrb[8].mxu1 }
 0xb4f   :  { %v1483_v26 = vadd.f32 %v3499_v57, %v1482_v25  ;;  %v2415_v27 = vpop.f32.mrb[9].mxu1  ;;  %v2186_v25 = vld [vmem:[#allocation22] ss:$0 sm:$0xff] }
 0xb50   :  { %v2187_v27 = vld [vmem:[#allocation23] ss:$0 sm:$0xff] }
 0xb51   :  { %1494 = vrot.lane.b32.xlu0 %v1483_v26, %s3097_s24  ;;  %v1486_v34 = vadd.f32 %v1483_v26, %v568_v33 }
 0xb53   :  { %v2182_v35 = vmul.f32 -1.442695, %v1486_v34 }
 0xb57   :  { %v2651_v21 = vpop.eup %2650 }
 0xb58   :  { %v1394_v28 = vadd.f32 1.0, %v2651_v21 }
 0xb5a   :  { %2652 = vrcp.f32 %v1394_v28 }
 0xb5b   :  { %2654 = vpow2.f32 %v2182_v35 }
 0xb5c   :  { %v1399_v30 = vpop.permute.xlu1 %1398 }
 0xb64   :  { %v2653_v29 = vpop.eup %2652 }
 0xb65   :  { %v1401_v31 = vmul.f32 %v2653_v29, %v1399_v30  ;;  %v2655_v36 = vpop.eup %2654  ;;  %v1408_v61 = vsub.f32 1.0, %v2653_v29  ;;  %v1414_v49 = vmul.f32 %v2653_v29, %v3636_v6 }
 0xb66   :  { %v1490_v38 = vadd.f32 1.0, %v2655_v36 }
 0xb67   :  { %1403 = vrot.lane.b32.xlu1 %v1401_v31, %s3097_s24 }
 0xb68   :  { %2656 = vrcp.f32 %v1490_v38 }
 0xb72   :  { %v2657_v57 = vpop.eup %2656 }
 0xb73   :  { %v1504_v54 = vsub.f32 1.0, %v2657_v57  ;;  %v1510_v59 = vmul.f32 %v2657_v57, %v3641_v12 }
 0xbc3   :  { %v1495_v40 = vpop.permute.xlu0 %1494 }
 0xbc4   :  { %v1497_v41 = vmul.f32 %v2657_v57, %v1495_v40 }
 0xbc6   :  { %1499 = vrot.lane.b32.xlu0 %v1497_v41, %s3097_s24 }
 0xbd9   :  { %v1404_v42 = vpop.permute.xlu1 %1403 }
 0xbda   :  { %v1406_v43 = vadd.f32 %v1404_v42, %v1312_v19  ;;  %v314_v42 = vld [vmem:[%s3828_s23] sm:$0xff] }
 0xbdc   :  { %2658 = vtanh.f32 %v1406_v43  ;;  %v315_v43 = vld [vmem:[%s3828_s23 + $0x8] sm:$0xff] }
 0xbe6   :  { %v2659_v44 = vpop.eup %2658 }
 0xbe7   :  { %1410 = vrot.lane.b32.xlu1 %v2659_v44, %s3099_s14  ;;  %v316_v44 = vld [vmem:[%s3828_s23 + $0x10] sm:$0xff] }
 0xc38   :  { %v1500_v46 = vpop.permute.xlu0 %1499 }
 0xc39   :  { %v1502_v47 = vadd.f32 %v1500_v46, %v568_v33  ;;  %v2574_v46 = vpack.c.bf16 %v315_v43, %v314_v42 }
 0xc3b   :  { %2660 = vtanh.f32 %v1502_v47  ;;  %v317_v47 = vld [vmem:[%s3828_s23 + $0x18] sm:$0xff] }
 0xc45   :  { %v2661_v55 = vpop.eup %2660 }
 0xc46   :  { %1506 = vrot.lane.b32.xlu0 %v2661_v55, %s3099_s14  ;;  %v2577_v55 = vpack.c.bf16 %v317_v47, %v316_v44 }
 0xc59   :  { %v1411_v48 = vpop.permute.xlu1 %1410 }
 0xc5a   :  { %v1413_v50 = vmul.f32 %v1411_v48, %v1408_v61  ;;  %v310_v48 = vld [vmem:[#allocation26] sm:$0xff] }
 0xc5c   :  { %v3678_v51 = vadd.f32 %v1414_v49, %v1413_v50  ;;  %v311_v49 = vld [vmem:[#allocation26 + $0x8] sm:$0xff]  ;;  %v312_v50 = vld [vmem:[#allocation26 + $0x10] sm:$0xff] }
 0xc5e   :  { %1588 = vrot.lane.b32.xlu1 %v3678_v51, %s3099_s14 }
 0xc62   :  { %1691 = vperm.xlu1 %2618, %v1688_v52   ;;  %v2568_v52 = vpack.c.bf16 %v311_v49, %v310_v48 }
 0xcb8   :  { %v1507_v58 = vpop.permute.xlu0 %1506 }
 0xcb9   :  { %v1509_v60 = vmul.f32 %v1507_v58, %v1504_v54  ;;  %v313_v54 = vld [vmem:[#allocation26 + $0x18] sm:$0xff] }
 0xcba   :  { %v2571_v58 = vpack.c.bf16 %v313_v54, %v312_v50 }
 0xcbb   :  { %v3686_v62 = vadd.f32 %v1510_v59, %v1509_v60 }
 0xcbd   :  { %1513 = vrot.lane.b32.xlu0 %v3686_v62, %s3099_s14 }
 0xcd0   :  { %v1589_v63 = vpop.permute.xlu1 %1588 }
 0xcd1   :  { %2436 = vmatmul.mubr.msk.f32.vlgmr.msra.gmra.mrb[10].mxu1 %vm580_vm4, %v1589_v63 }
 0xcd2   :  { %2457 = vmatprep.mubr.msk.f32.mxu1 %vm3093_vm0, %v3092_v0  ;;  %2569 = vmatpush3.bf16.msra.mxu1 %v2568_v52 }
 0xcd3   :  { %2570 = vmatprep.subr.bf16.mxu1 %v3096_v11 }
 0xcd6   :  { %2572 = vmatpush3.bf16.msra.mxu1 %v2571_v58 }
 0xd2f   :  { %v1514_v5 = vpop.permute.xlu0 %1513 }
 0xd30   :  { %2425 = vmatmul.mubr.msk.f32.vlgmr.msra.gmra.mrb[16].mxu0 %vm580_vm4, %v1514_v5 }
 0xd31   :  { %2563 = vmatpush3.bf16.msra.mxu0 %v2562_v56  ;;  %2446 = vmatprep.mubr.msk.f32.mxu0 %vm3093_vm0, %v3092_v0 }
 0xd32   :  { %2564 = vmatprep.subr.bf16.mxu0 %v3096_v11 }
 0xd35   :  { %2566 = vmatpush3.bf16.msra.mxu0 %v2565_v53 }
 0xd36   :  { %2573 = vmatprep.subr.bf16.mxu0 %v3096_v11 }
 0xd38   :  { %2447 = vmatmul.mubr.msk.f32.vlgmr.msra.gmra.mrb[18].mxu0 %vm580_vm4, %v1514_v5 }
 0xd39   :  { %2468 = vmatprep.mubr.msk.f32.mxu0 %vm3093_vm0, %v3092_v0  ;;  %2575 = vmatpush3.bf16.msra.mxu0 %v2574_v46 }
 0xd3a   :  { %2576 = vmatprep.subr.bf16.mxu0 %v3096_v11 }
 0xd3d   :  { %2578 = vmatpush3.bf16.msra.mxu0 %v2577_v55 }
 0xda4   :  { %v1658_v7 = vpop.f32.mrb[10].mxu1 }
 0xda5   :  { %v1659_v8 = vadd.f32 %v3563_v32, %v1658_v7  ;;  %v2437_v9 = vpop.f32.mrb[11].mxu1 }
 0xda7   :  { %1670 = vrot.lane.b32.xlu0 %v1659_v8, %s3097_s24 }
 0xe03   :  { %v1583_v10 = vpop.f32.mrb[16].mxu0 }
 0xe04   :  { %v1584_v12 = vadd.f32 %v3581_v37, %v1583_v10  ;;  %v2426_v16 = vpop.f32.mrb[17].mxu0  ;;  %v1692_v37 = vpop.permute.xlu1 %1691 }
 0xe05   :  { %v1700_v26 = vmul.f32 %v2186_v25, %v1692_v37  ;;  %v279_v37 = vld [vmem:[%s3873_s9] sm:$0xff] }
 0xe06   :  { %v1662_v18 = vadd.f32 %v1659_v8, %v1584_v12  ;;  %v2193_v8 = vld [vmem:[%s3830_s25] ss:$0 sm:$0xff] }
 0xe07   :  { %v1707_v21 = vadd.f32 %v2187_v27, %v1700_v26  ;;  %v280_v26 = vld [vmem:[%s3873_s9 + $0x8] sm:$0xff]  ;;  %v281_v27 = vld [vmem:[%s3873_s9 + $0x10] sm:$0xff] }
 0xe08   :  { %v2185_v39 = vmul.f32 -1.442695, %v1662_v18 }
 0xe0a   :  { %2662 = vpow2.f32 %v2185_v39 }
 0xe0b   :  { %v1780_v23 = vpop.f32.mrb[18].mxu0 }
 0xe0c   :  { %v1781_v45 = vadd.f32 %v2188_v22, %v1780_v23  ;;  %v2448_v19 = vpop.f32.mrb[19].mxu0 }
 0xe0e   :  { %1792 = vrot.lane.b32.xlu1 %v1781_v45, %s3097_s24  ;;  %v1784_v28 = vadd.f32 %v1781_v45, %v1707_v21 }
 0xe10   :  { %v2190_v29 = vmul.f32 -1.442695, %v1784_v28  ;;  %v282_v28 = vld [vmem:[%s3873_s9 + $0x18] sm:$0xff] }
 0xe14   :  { %v2663_v0 = vpop.eup %2662 }
 0xe15   :  { %v1666_v20 = vadd.f32 1.0, %v2663_v0 }
 0xe17   :  { %2664 = vrcp.f32 %v1666_v20 }
 0xe18   :  { %2666 = vpow2.f32 %v2190_v29  ;;  %v2583_v29 = vpack.c.bf16 %v282_v28, %v281_v27 }
 0xe19   :  { %v1671_v15 = vpop.permute.xlu0 %1670 }
 0xe21   :  { %v2665_v32 = vpop.eup %2664 }
 0xe22   :  { %v1673_v24 = vmul.f32 %v2665_v32, %v1671_v15  ;;  %v2667_v30 = vpop.eup %2666  ;;  %v1680_v59 = vsub.f32 1.0, %v2665_v32  ;;  %v1686_v63 = vmul.f32 %v2665_v32, %v3678_v51 }
 0xe23   :  { %v1788_v31 = vadd.f32 1.0, %v2667_v30 }
 0xe24   :  { %1675 = vrot.lane.b32.xlu0 %v1673_v24, %s3097_s24 }
 0xe25   :  { %2668 = vrcp.f32 %v1788_v31 }
 0xe2f   :  { %v2669_v33 = vpop.eup %2668 }
 0xe30   :  { %v1802_v56 = vsub.f32 1.0, %v2669_v33  ;;  %v1808_v4 = vmul.f32 %v2669_v33, %v3686_v62  ;;  %v2191_v62 = vld [vmem:[%s3872_s27] ss:$0 sm:$0xff] }
 0xe80   :  { %v1793_v34 = vpop.permute.xlu1 %1792 }
 0xe81   :  { %v1795_v35 = vmul.f32 %v2669_v33, %v1793_v34 }
 0xe83   :  { %1797 = vrot.lane.b32.xlu1 %v1795_v35, %s3097_s24 }
 0xe96   :  { %v1676_v36 = vpop.permute.xlu0 %1675 }
 0xe97   :  { %v1678_v38 = vadd.f32 %v1676_v36, %v1584_v12 }
 0xe99   :  { %2670 = vtanh.f32 %v1678_v38 }
 0xea3   :  { %v2671_v57 = vpop.eup %2670 }
 0xea4   :  { %1682 = vrot.lane.b32.xlu0 %v2671_v57, %s3099_s14 }
 0xef5   :  { %v1798_v40 = vpop.permute.xlu1 %1797 }
 0xef6   :  { %v1800_v41 = vadd.f32 %v1798_v40, %v1707_v21  ;;  %v2579_v21 = vpack.c.bf16 %v280_v26, %v279_v37 }
 0xef8   :  { %2672 = vtanh.f32 %v1800_v41  ;;  %2580 = vmatprep.subr.bf16.mxu1 %v2579_v21 }
 0xf02   :  { %v2673_v61 = vpop.eup %2672 }
 0xf03   :  { %1804 = vrot.lane.b32.xlu1 %v2673_v61, %s3099_s14 }
 0xf16   :  { %v1683_v60 = vpop.permute.xlu0 %1682 }
 0xf17   :  { %v1685_v1 = vmul.f32 %v1683_v60, %v1680_v59 }
 0xf19   :  { %v1687_v2 = vadd.f32 %v1686_v63, %v1685_v1 }
 0xf1b   :  { %1898 = vrot.lane.b32.xlu0 %v1687_v2, %s3099_s14 }
 0xf75   :  { %v1805_v3 = vpop.permute.xlu1 %1804 }
 0xf76   :  { %v1807_v5 = vmul.f32 %v1805_v3, %v1802_v56 }
 0xf78   :  { %v1809_v53 = vadd.f32 %v1808_v4, %v1807_v5 }
 0xf7a   :  { %1817 = vrot.lane.b32.xlu1 %v1809_v53, %s3099_s14 }
 0xf8d   :  { %v1899_v7 = vpop.permute.xlu0 %1898 }
 0xf8e   :  { %2469 = vmatmul.mubr.msk.f32.vlgmr.msra.gmra.mrb[20].mxu0 %vm580_vm4, %v1899_v7 }
 0xfec   :  { %v1818_v11 = vpop.permute.xlu1 %1817 }
 0xfed   :  { %2123 = vst.msk [vmem:[#allocation28] sm:$0xff] %vm580_vm4, %v1818_v11  ;;  %2458 = vmatmul.mubr.msk.f32.vlgmr.msra.gmra.mrb[12].mxu1 %vm580_vm4, %v1818_v11 }
 0xfee   :  { %2582 = vmatpush3.bf16.msra.mxu1 %v2579_v21 }
 0xfef   :  { %2584 = vmatprep.subr.bf16.mxu1 %v2583_v29 }
 0xff2   :  { %2586 = vmatpush3.bf16.msra.mxu1 %v2583_v29 }
0x1061   :  { %v1968_v9 = vpop.f32.mrb[20].mxu0 }
0x1062   :  { %v1969_v10 = vadd.f32 %v2193_v8, %v1968_v9  ;;  %v2470_v12 = vpop.f32.mrb[21].mxu0 }
0x1064   :  { %1980 = vrot.lane.b32.xlu0 %v1969_v10, %s3097_s24 }
0x10c0   :  { %v1887_v16 = vpop.f32.mrb[12].mxu1 }
0x10c1   :  { %v1888_v18 = vadd.f32 %v2191_v62, %v1887_v16  ;;  %v2459_v39 = vpop.f32.mrb[13].mxu1 }
0x10c3   :  { %v1972_v22 = vadd.f32 %v1969_v10, %v1888_v18 }
0x10c5   :  { %v2195_v23 = vmul.f32 -1.442695, %v1972_v22 }
0x10c7   :  { %2674 = vpow2.f32 %v2195_v23 }
0x10d1   :  { %v2675_v45 = vpop.eup %2674 }
0x10d2   :  { %v1976_v19 = vadd.f32 1.0, %v2675_v45 }
0x10d4   :  { %2676 = vrcp.f32 %v1976_v19 }
0x10d6   :  { %v1981_v20 = vpop.permute.xlu0 %1980 }
0x10de   :  { %v2677_v0 = vpop.eup %2676 }
0x10df   :  { %v1983_v32 = vmul.f32 %v2677_v0, %v1981_v20  ;;  %v1990_v30 = vsub.f32 1.0, %v2677_v0  ;;  %v1996_v33 = vmul.f32 %v2677_v0, %v1687_v2 }
0x10e1   :  { %1985 = vrot.lane.b32.xlu1 %v1983_v32, %s3097_s24 }
0x1153   :  { %v1986_v15 = vpop.permute.xlu1 %1985 }
0x1154   :  { %v1988_v24 = vadd.f32 %v1986_v15, %v1888_v18 }
0x1156   :  { %2678 = vtanh.f32 %v1988_v24 }
0x1160   :  { %v2679_v25 = vpop.eup %2678 }
0x1161   :  { %1992 = vrot.lane.b32.xlu0 %v2679_v25, %s3099_s14 }
0x11d3   :  { %v1993_v31 = vpop.permute.xlu0 %1992 }
0x11d4   :  { %v1995_v34 = vmul.f32 %v1993_v31, %v1990_v30 }
0x11d6   :  { %v1997_v35 = vadd.f32 %v1996_v33, %v1995_v34 }
0x11d8   :  { %v1999_v36 = vadd.f32 %v1997_v35, %v3636_v6  ;;  %v1998_v38 = vadd.f32 %v1997_v35, %v3594_v17  ;;  %v2001_v57 = vadd.f32 %v1997_v35, %v1687_v2  ;;  %v2000_v40 = vadd.f32 %v1997_v35, %v3678_v51 }
0x11da   :  { %2014 = vrot.lane.b32.xlu0 %v1999_v36, %s3099_s14  ;;  %2012 = vrot.lane.b32.xlu1 %v1998_v38, %s3099_s14 }
0x11de   :  { %2018 = vrot.lane.b32.xlu0 %v2001_v57, %s3099_s14  ;;  %2016 = vrot.lane.b32.xlu1 %v2000_v40, %s3099_s14 }
0x11e2   :  { %2119 = vrot.lane.b32.xlu1 %v1997_v35, %s3099_s14 }
0x124c   :  { %v2015_v41 = vpop.permute.xlu0 %2014  ;;  %v2013_v42 = vpop.permute.xlu1 %2012 }
0x124d   :  { %2479 = vmatprep.mubr.msk.f32.mxu1 %vm580_vm4, %v2013_v42 }
0x124e   :  { %2480 = vmatmul.mubr.msk.f32.vlgmr.msra.gmra.mrb[14].mxu1 %vm580_vm4, %v2015_v41 }
0x1250   :  { %v2019_v17 = vpop.permute.xlu0 %2018  ;;  %v2017_v6 = vpop.permute.xlu1 %2016 }
0x1251   :  { %2482 = vmatprep.mubr.msk.f32.mxu1 %vm580_vm4, %v2017_v6 }
0x1252   :  { %2483 = vmatmul.mubr.msk.f32.gmra.mrb[16].mxu1 %vm580_vm4, %v2019_v17 }
0x1254   :  { %v2120_v43 = vpop.permute.xlu1 %2119 }
0x1255   :  { %2124 = vst.msk [vmem:[#allocation28 + $0x8] sm:$0xff] %vm580_vm4, %v2120_v43 }
0x1256   :  { %3043 = shalt.err (!%p3040_p6)
}
0x1257   :  { %s3874_s26 = sld [smem:[#allocation53_spill]] }
0x125d   :  { %s3044_s3 = scalar_lea.hbm %s3874_s26, 256 }
0x125e   :  { %p3045_p7 = scmp.ne.s32.totalorder %s3874_s26, %s3044_s3  ;;  %p3048_p8 = scmp.lt.u32.totalorder %s3044_s3, %s3874_s26 }
0x1260   :  { %p3050_p9 = pnand %p3048_p8, %p3045_p7 }
0x1262   :  { %3053 = shalt.err (!%p3050_p9)
}
0x1263   :  { %2138 = dma.vmem_to_hbm [thread:$0]  %s2133_s7, 256, %s3874_s26, [#allocation4], %s3075_s6, %s3075_s6, %s3076_s11   ;;  %v283_v51 = vld [vmem:[#allocation13] sm:$0x1]  ;;  %vm2113_vm5 = vcmask 15360  }
0x1264   :  { %v284_v44 = vmul.f32 2.0, %v283_v51  ;;  %s3875_s23 = sld [smem:[#allocation52_spill]] }
0x1266   :  { %v2006_v46 = vrot.slane %v284_v44, %v340_v14 }
0x1321   :  { %v2481_v47 = vpop.f32.mrb[14].mxu1 }
0x1322   :  { %v2100_v55 = vadd.f32 %v2481_v47, %v2006_v46  ;;  %v2094_v61 = vpop.f32.mrb[15].mxu1 }
0x1323   :  { %v2095_v48 = vadd.f32 %v2094_v61, %v2006_v46 }
0x1324   :  { %2115 = vst.msk [vmem:[%s3875_s23 + $0x8] sm:$0xff] %vm2113_vm5, %v2100_v55 }
0x1325   :  { %2114 = vst.msk [vmem:[%s3875_s23] sm:$0xff] %vm2113_vm5, %v2095_v48  ;;  %v2484_v49 = vpop.f32.mrb[16].mxu1 }
0x1326   :  { %v2110_v50 = vadd.f32 %v2484_v49, %v2006_v46  ;;  %v2104_v52 = vpop.f32.mrb[17].mxu1 }
0x1327   :  { %v2105_v54 = vadd.f32 %v2104_v52, %v2006_v46 }
0x1328   :  { %2117 = vst.msk [vmem:[%s3875_s23 + $0x18] sm:$0xff] %vm2113_vm5, %v2110_v50 }
0x1329   :  { %2116 = vst.msk [vmem:[%s3875_s23 + $0x10] sm:$0xff] %vm2113_vm5, %v2105_v54 }
0x132a   :  { %3072 = dma.done.wait [#allocation4], 256  }
0x132b   :  { %3073 = vsyncadd [#allocation4], 4294967040 }
0x132c   :  { %2144 = vsyncpa [#allocation3], 1 }
0x132d   :  { %2145 = vsyncpa [#allocation6], 1 }
0x132e   :  { %2146 = vsyncpa [#allocation9], 1 }
0x132f   :  { %2147 = vsyncpa [#allocation12], 1 }
0x1330   :  { %2148 = vsyncpa [#allocation15], 1 }
0x1331   :  { %2149 = vsyncpa [#allocation18], 1 }
0x1332   :  { %2150 = vsyncpa [#allocation21], 1 }
0x1333   :  { %2151 = vsyncpa [#allocation24], 1 }
0x1334   :  { %2152 = vsyncpa [#allocation27], 1 }
0x1335   :  { %2153 = vsyncpa [#allocation4], 1 }

</bundles_post_ra>
